<compile_context>
chip_gen: v5e
topology: v5e:2x2
jax: 0.10.0
libtpu: 0.0.40
codegen_flags: <defaults>
</compile_context>

<pallas_src>
import functools
import math

import jax
import jax.numpy as jnp
import numpy as np
from jax import lax
from jax.experimental import pallas as pl
from jax.experimental.pallas import tpu as pltpu


_UNROLL_MAX = 64   # fully-unrolled, SSA-carried path up to this dimension


def _check_prior_kernel_unrolled(var_ref, scalars_ref, out_ref,
                                 lt_ref, dinv_ref, *, p, df):
    """Small-p path: fully unrolled, W and Z carried in vregs (SSA).

    var_ref:     (p, p) f32 VMEM   SPD matrix
    scalars_ref: (2,)   f32 SMEM   [beta, logpdf_const]
    out_ref:     (1, 1) f32 VMEM
    lt_ref:      (p, p) f32 VMEM scratch  -- L^T rows (controlled spill for the solve)
    dinv_ref:    (p, 1) f32 VMEM scratch  -- 1/diag(L) (exact rsqrt, reused in the solve)
    """
    f32 = jnp.float32
    row_ids_col = lax.broadcasted_iota(jnp.int32, (p, 1), 0)   # (p,1)
    col_ids_row = lax.broadcasted_iota(jnp.int32, (1, p), 1)   # (1,p)

    def lane_select(vec_1p, j):
        # Element j of a (1,p) vector as a (1,1): masked XLU lane reduce (no single-lane
        # value slicing, keeps the VPU/vex slots free).
        return jnp.sum(jnp.where(col_ids_row == j, vec_1p, 0.0), axis=1, keepdims=True)

    # ---------------- Cholesky: right-looking, one column per (unrolled) step ----------------
    W = var_ref[...].astype(f32)                      # SSA working copy (stays exactly symmetric)
    d_cur = lane_select(W[0:1, :], 0)                 # pivot W[0,0]
    r_cur = lax.rsqrt(d_cur)                          # 1 / L[0,0]
    main_acc = jnp.zeros((1, 1), f32)                 # running sum |diag(L)|
    log_acc = jnp.zeros((1, 1), f32)                  # running sum log diag(L)

    for j in range(p):
        wrow = W[j:j + 1, :]                                          # (1,p) row j of W
        lrow = jnp.where(col_ids_row >= j, wrow * r_cur, 0.0)         # (1,p) row j of L^T
        lt_ref[j:j + 1, :] = lrow                                     # off the critical chain
        dinv_ref[j:j + 1, :] = r_cur
        diag = d_cur * r_cur                                          # = sqrt(pivot), no divide
        main_acc = main_acc + jnp.abs(diag)
        log_acc = log_acc + jnp.log(diag)                             # EUP slot (free filler)

        if j + 1 < p:
            # --- software-pipelined next pivot: rsqrt issued BEFORE the rank-1 update ---
            lnext = lane_select(lrow, j + 1)                          # (1,1) = L[j+1, j]
            d_nxt = lane_select(W[j + 1:j + 2, :], j + 1) - lnext * lnext
            r_nxt = lax.rsqrt(d_nxt)
            # --- rank-1 trailing update (VPU).  Column = transpose of the masked row via
            #     the symmetric W, so the update is bit-exactly symmetric (no MXU). ---
            wcol = jnp.sum(jnp.where(col_ids_row == j, W, 0.0), axis=1, keepdims=True)  # (p,1)
            lcol = jnp.where(row_ids_col >= j, wcol * r_cur, 0.0)     # (p,1) = L[:, j]
            W = W - lcol * lrow
            d_cur, r_cur = d_nxt, r_nxt

    # ---------------- back substitution on U = L^T:  Z = U^{-1}, rows p-1 .. 0 ----------------
    Z = jnp.zeros((p, p), f32)                        # SSA, row-updated via select
    fro_acc = jnp.zeros((1, 1), f32)                  # running ||Z||_F^2 = tr(X^{-1})
    for t in range(p):
        i = p - 1 - t
        urow = lt_ref[i:i + 1, :]                                     # (1,p) row i of U
        rinv = dinv_ref[i:i + 1, :]                                   # (1,1) = 1/U[i,i]
        s = jnp.dot(urow, Z, preferred_element_type=f32)              # (1,p) MXU matvec (f32)
        e_row = (col_ids_row == i).astype(f32)
        zrow = (e_row - s) * rinv                                     # (1,p) row i of Z
        Z = jnp.where(row_ids_col == i, zrow, Z)
        fro_acc = fro_acc + jnp.sum(zrow * zrow, axis=1, keepdims=True)

    # ---------------- epilogue ----------------
    beta = scalars_ref[0]
    const = scalars_ref[1]      # 0.5*df*log|scale| - 0.5*df*p*log2 - multigammaln(df/2, p)
    logdet_x = 2.0 * log_acc
    trace_term = fro_acc * (1.0 / float(p))                           # tr((I/p) @ X^{-1})
    logpdf = const - 0.5 * (float(df) + float(p) + 1.0) * logdet_x - 0.5 * trace_term
    out_ref[...] = main_acc - beta * logpdf


def _check_prior_kernel_looped(var_ref, scalars_ref, out_ref,
                               w_ref, lt_ref, z_ref, dinv_ref, diag_ref, *, p, df):
    """Large-p fallback: scratch-ref working matrices, fori_loop(unroll=4).

    Matvec-free pivot/column derivation; diag(L) saved so the epilogue has no divide.
    TODO(synk): blocked SYRK formulation for p >= ~256 (see header note).
    """
    f32 = jnp.float32
    row_ids_col = lax.broadcasted_iota(jnp.int32, (p, 1), 0)
    col_ids_row = lax.broadcasted_iota(jnp.int32, (1, p), 1)

    w_ref[...] = var_ref[...].astype(f32)
    z_ref[...] = jnp.zeros((p, p), f32)

    def chol_step(j, carry):
        W = w_ref[...]                                                # (p,p)
        wrow = w_ref[pl.ds(j, 1), :]                                  # (1,p)
        is_j = (col_ids_row == j)                                     # (1,p)
        d = jnp.sum(jnp.where(is_j, wrow, 0.0), axis=1, keepdims=True)   # (1,1) pivot
        r = lax.rsqrt(d)                                              # 1 / L[j,j]
        lrow = jnp.where(col_ids_row >= j, wrow * r, 0.0)             # (1,p)
        # Column from the symmetric W via masked lane reduce (no MXU, bit-exact symmetric).
        wcol = jnp.sum(jnp.where(is_j, W, 0.0), axis=1, keepdims=True)   # (p,1)
        lcol = jnp.where(row_ids_col >= j, wcol * r, 0.0)             # (p,1)
        lt_ref[pl.ds(j, 1), :] = lrow
        dinv_ref[pl.ds(j, 1), :] = r
        diag_ref[pl.ds(j, 1), :] = d * r                              # sqrt(pivot)
        w_ref[...] = W - lcol * lrow                                  # rank-1 trailing update
        return carry

    def solve_step(t, carry):
        i = p - 1 - t
        urow = lt_ref[pl.ds(i, 1), :]                                 # (1,p)
        s = jnp.dot(urow, z_ref[...], preferred_element_type=f32)     # (1,p)
        e_row = (col_ids_row == i).astype(f32)
        rinv = dinv_ref[pl.ds(i, 1), :]                               # (1,1)
        z_ref[pl.ds(i, 1), :] = (e_row - s) * rinv
        return carry

    lax.fori_loop(0, p, chol_step, 0, unroll=4)
    lax.fori_loop(0, p, solve_step, 0, unroll=4)

    diag = diag_ref[...]                                              # (p,1) = diag(L)
    main_loss = jnp.sum(jnp.abs(diag), axis=0, keepdims=True)         # (1,1)
    logdet_x = 2.0 * jnp.sum(jnp.log(diag), axis=0, keepdims=True)    # (1,1)
    z = z_ref[...]
    fro2 = jnp.sum(jnp.sum(z * z, axis=1, keepdims=True), axis=0, keepdims=True)

    beta = scalars_ref[0]
    const = scalars_ref[1]
    trace_term = fro2 * (1.0 / float(p))
    logpdf = const - 0.5 * (float(df) + float(p) + 1.0) * logdet_x - 0.5 * trace_term
    out_ref[...] = main_loss - beta * logpdf


def _multigammaln(a, p):
    # float64 host-side computation (avoids f32 cancellation in the constant).
    return 0.25 * p * (p - 1) * math.log(math.pi) + sum(
        math.lgamma(a + (1.0 - j) / 2.0) for j in range(1, p + 1))


def _logpdf_const(df, p):
    logdet_scale = -p * math.log(p)          # scale = I/p
    return (0.5 * df * logdet_scale
            - 0.5 * df * p * math.log(2.0)
            - _multigammaln(df / 2.0, p))


def check_prior(var, beta, *, df=None):
    """Pallas implementation of CheckPrior.forward(beta). Returns a scalar.

    NOTE: no SPD guard -- non-SPD `var` produces NaN, matching torch.cholesky.
    """
    p = var.shape[0]
    df = float(p) if df is None else float(df)
    const = _logpdf_const(df, p)             # python float (f64 precision)
    scalars = jnp.stack([jnp.asarray(beta, jnp.float32),
                         jnp.asarray(const, jnp.float32)])

    if p <= _UNROLL_MAX:
        kernel = functools.partial(_check_prior_kernel_unrolled, p=p, df=df)
        scratch = [
            pltpu.VMEM((p, p), jnp.float32),   # Lt : L^T rows
            pltpu.VMEM((p, 1), jnp.float32),   # dinv : 1/diag(L)
        ]
    else:
        kernel = functools.partial(_check_prior_kernel_looped, p=p, df=df)
        scratch = [
            pltpu.VMEM((p, p), jnp.float32),   # W  : symmetric working copy
            pltpu.VMEM((p, p), jnp.float32),   # Lt : L^T
            pltpu.VMEM((p, p), jnp.float32),   # Z  : (L^T)^{-1}
            pltpu.VMEM((p, 1), jnp.float32),   # dinv : 1/diag(L)
            pltpu.VMEM((p, 1), jnp.float32),   # diag : diag(L)
        ]

    out = pl.pallas_call(
        kernel,
        out_shape=jax.ShapeDtypeStruct((1, 1), jnp.float32),
        in_specs=[
            pl.BlockSpec(memory_space=pltpu.MemorySpace.VMEM),   # var (p, p)
            pl.BlockSpec(memory_space=pltpu.MemorySpace.SMEM),   # [beta, const]
        ],
        out_specs=pl.BlockSpec(memory_space=pltpu.MemorySpace.VMEM),
        scratch_shapes=scratch,
    )(var.astype(jnp.float32), scalars)
    return out[0, 0]


def check_prior_ref(var, beta, *, df=None):
    """Pure-JAX reference of the same forward pass."""
    p = var.shape[0]
    df = float(p) if df is None else float(df)
    L = jnp.linalg.cholesky(var)
    main_loss = jnp.sum(jnp.abs(jnp.diag(L)))
    logdet_x = 2.0 * jnp.sum(jnp.log(jnp.diag(L)))
    Linv = jax.scipy.linalg.solve_triangular(L, jnp.eye(p, dtype=var.dtype), lower=True)
    trace_term = jnp.sum(Linv * Linv) / p
    const = _logpdf_const(df, p)
    logpdf = const - 0.5 * (df + p + 1.0) * logdet_x - 0.5 * trace_term
    return main_loss - beta * logpdf


if __name__ == "__main__":
    dim = 8
    key = jax.random.PRNGKey(0)
    a = jax.random.normal(key, (dim, dim), dtype=jnp.float32)
    # Deterministic stand-in for invwishart.rvs(dim, eye(dim)/dim): an SPD matrix.
    var = (a @ a.T) / dim + 0.5 * jnp.eye(dim, dtype=jnp.float32)
    beta = 0.5

    out = jax.block_until_ready(check_prior(var, beta))
    ref = jax.block_until_ready(check_prior_ref(var, beta))
    np.testing.assert_allclose(np.asarray(out), np.asarray(ref), rtol=5e-3, atol=5e-3)
    print("KERNEL_OK")
</pallas_src>

<mosaic_0001>
module attributes {stable_mosaic.version = 11 : i64} {
  func.func @_check_prior_kernel_unrolled(%arg0: memref<8x8xf32, #tpu.memory_space<vmem>>, %arg1: memref<2xf32, #tpu.memory_space<smem>>, %arg2: memref<1x1xf32, #tpu.memory_space<vmem>>, %arg3: memref<8x8xf32, #tpu.memory_space<vmem>>, %arg4: memref<8x1xf32, #tpu.memory_space<vmem>>) attributes {dimension_semantics = [], scalar_prefetch = 0 : i64, scratch_operands = 2 : i64, tpu.core_type = #tpu.core_type<tc>} {
    %0 = tpu.iota {dimensions = array<i32: 0>} : vector<8x1xi32>
    %1 = tpu.iota {dimensions = array<i32: 1>} : vector<1x8xi32>
    %c0 = arith.constant 0 : index
    %c0_0 = arith.constant 0 : index
    %2 = vector.load %arg0[%c0, %c0_0] : memref<8x8xf32, #tpu.memory_space<vmem>>, vector<8x8xf32>
    %3 = vector.extract_strided_slice %2 {offsets = [0, 0], sizes = [1, 8], strides = [1, 1]} : vector<8x8xf32> to vector<1x8xf32>
    %c0_i32 = arith.constant 0 : i32
    %4 = vector.broadcast %c0_i32 : i32 to vector<1x8xi32>
    %5 = arith.cmpi eq, %1, %4 : vector<1x8xi32>
    %cst = arith.constant 0.000000e+00 : f32
    %6 = vector.broadcast %cst : f32 to vector<1x8xf32>
    %7 = arith.select %5, %3, %6 : vector<1x8xi1>, vector<1x8xf32>
    %cst_1 = arith.constant dense<0.000000e+00> : vector<1xf32>
    %8 = vector.multi_reduction <add>, %7, %cst_1 [1] : vector<1x8xf32> to vector<1xf32>
    %9 = vector.shape_cast %8 : vector<1xf32> to vector<1x1xf32>
    %10 = math.rsqrt %9 : vector<1x1xf32>
    %cst_2 = arith.constant 0.000000e+00 : f32
    %11 = vector.broadcast %cst_2 : f32 to vector<1x1xf32>
    %cst_3 = arith.constant 0.000000e+00 : f32
    %12 = vector.broadcast %cst_3 : f32 to vector<1x1xf32>
    %13 = vector.extract_strided_slice %2 {offsets = [0, 0], sizes = [1, 8], strides = [1, 1]} : vector<8x8xf32> to vector<1x8xf32>
    %c0_i32_4 = arith.constant 0 : i32
    %14 = vector.broadcast %c0_i32_4 : i32 to vector<1x8xi32>
    %15 = arith.cmpi sge, %1, %14 : vector<1x8xi32>
    %16 = vector.broadcast %10 : vector<1x1xf32> to vector<1x8xf32>
    %17 = arith.mulf %13, %16 : vector<1x8xf32>
    %cst_5 = arith.constant 0.000000e+00 : f32
    %18 = vector.broadcast %cst_5 : f32 to vector<1x8xf32>
    %19 = arith.select %15, %17, %18 : vector<1x8xi1>, vector<1x8xf32>
    %c0_6 = arith.constant 0 : index
    %c0_7 = arith.constant 0 : index
    %20 = vector.load %arg3[%c0_6, %c0_7] : memref<8x8xf32, #tpu.memory_space<vmem>>, vector<1x8xf32>
    tpu.vector_store %arg3[%c0_6, %c0_7], %19 {strides = array<i32>} : memref<8x8xf32, #tpu.memory_space<vmem>>, vector<1x8xf32>,
    %c0_8 = arith.constant 0 : index
    %c0_9 = arith.constant 0 : index
    %21 = vector.load %arg4[%c0_8, %c0_9] : memref<8x1xf32, #tpu.memory_space<vmem>>, vector<1x1xf32>
    tpu.vector_store %arg4[%c0_8, %c0_9], %10 {strides = array<i32>} : memref<8x1xf32, #tpu.memory_space<vmem>>, vector<1x1xf32>,
    %22 = arith.mulf %9, %10 : vector<1x1xf32>
    %23 = math.absf %22 : vector<1x1xf32>
    %24 = arith.addf %11, %23 : vector<1x1xf32>
    %25 = math.log %22 : vector<1x1xf32>
    %26 = arith.addf %12, %25 : vector<1x1xf32>
    %c1_i32 = arith.constant 1 : i32
    %27 = vector.broadcast %c1_i32 : i32 to vector<1x8xi32>
    %28 = arith.cmpi eq, %1, %27 : vector<1x8xi32>
    %cst_10 = arith.constant 0.000000e+00 : f32
    %29 = vector.broadcast %cst_10 : f32 to vector<1x8xf32>
    %30 = arith.select %28, %19, %29 : vector<1x8xi1>, vector<1x8xf32>
    %cst_11 = arith.constant dense<0.000000e+00> : vector<1xf32>
    %31 = vector.multi_reduction <add>, %30, %cst_11 [1] : vector<1x8xf32> to vector<1xf32>
    %32 = vector.shape_cast %31 : vector<1xf32> to vector<1x1xf32>
    %33 = vector.extract_strided_slice %2 {offsets = [1, 0], sizes = [1, 8], strides = [1, 1]} : vector<8x8xf32> to vector<1x8xf32>
    %c1_i32_12 = arith.constant 1 : i32
    %34 = vector.broadcast %c1_i32_12 : i32 to vector<1x8xi32>
    %35 = arith.cmpi eq, %1, %34 : vector<1x8xi32>
    %cst_13 = arith.constant 0.000000e+00 : f32
    %36 = vector.broadcast %cst_13 : f32 to vector<1x8xf32>
    %37 = arith.select %35, %33, %36 : vector<1x8xi1>, vector<1x8xf32>
    %cst_14 = arith.constant dense<0.000000e+00> : vector<1xf32>
    %38 = vector.multi_reduction <add>, %37, %cst_14 [1] : vector<1x8xf32> to vector<1xf32>
    %39 = vector.shape_cast %38 : vector<1xf32> to vector<1x1xf32>
    %40 = arith.mulf %32, %32 : vector<1x1xf32>
    %41 = arith.subf %39, %40 : vector<1x1xf32>
    %42 = math.rsqrt %41 : vector<1x1xf32>
    %c0_i32_15 = arith.constant 0 : i32
    %43 = vector.broadcast %c0_i32_15 : i32 to vector<1x8xi32>
    %44 = arith.cmpi eq, %1, %43 : vector<1x8xi32>
    %cst_16 = arith.constant 0.000000e+00 : f32
    %45 = vector.shape_cast %44 : vector<1x8xi1> to vector<1x8xi1>
    %46 = vector.broadcast %45 : vector<1x8xi1> to vector<8x8xi1>
    %47 = vector.broadcast %cst_16 : f32 to vector<8x8xf32>
    %48 = arith.select %46, %2, %47 : vector<8x8xi1>, vector<8x8xf32>
    %cst_17 = arith.constant dense<0.000000e+00> : vector<8xf32>
    %49 = vector.multi_reduction <add>, %48, %cst_17 [1] : vector<8x8xf32> to vector<8xf32>
    %50 = vector.shape_cast %49 : vector<8xf32> to vector<8x1xf32>
    %c0_i32_18 = arith.constant 0 : i32
    %51 = vector.broadcast %c0_i32_18 : i32 to vector<8x1xi32>
    %52 = arith.cmpi sge, %0, %51 : vector<8x1xi32>
    %53 = vector.broadcast %10 : vector<1x1xf32> to vector<8x1xf32>
    %54 = arith.mulf %50, %53 : vector<8x1xf32>
    %cst_19 = arith.constant 0.000000e+00 : f32
    %55 = vector.broadcast %cst_19 : f32 to vector<8x1xf32>
    %56 = arith.select %52, %54, %55 : vector<8x1xi1>, vector<8x1xf32>
    %57 = vector.broadcast %56 : vector<8x1xf32> to vector<8x8xf32>
    %58 = vector.broadcast %19 : vector<1x8xf32> to vector<8x8xf32>
    %59 = arith.mulf %57, %58 : vector<8x8xf32>
    %60 = arith.subf %2, %59 : vector<8x8xf32>
    %61 = vector.extract_strided_slice %60 {offsets = [1, 0], sizes = [1, 8], strides = [1, 1]} : vector<8x8xf32> to vector<1x8xf32>
    %c1_i32_20 = arith.constant 1 : i32
    %62 = vector.broadcast %c1_i32_20 : i32 to vector<1x8xi32>
    %63 = arith.cmpi sge, %1, %62 : vector<1x8xi32>
    %64 = vector.broadcast %42 : vector<1x1xf32> to vector<1x8xf32>
    %65 = arith.mulf %61, %64 : vector<1x8xf32>
    %cst_21 = arith.constant 0.000000e+00 : f32
    %66 = vector.broadcast %cst_21 : f32 to vector<1x8xf32>
    %67 = arith.select %63, %65, %66 : vector<1x8xi1>, vector<1x8xf32>
    %c1 = arith.constant 1 : index
    %c0_22 = arith.constant 0 : index
    %68 = vector.load %arg3[%c1, %c0_22] : memref<8x8xf32, #tpu.memory_space<vmem>>, vector<1x8xf32>
    tpu.vector_store %arg3[%c1, %c0_22], %67 {strides = array<i32>} : memref<8x8xf32, #tpu.memory_space<vmem>>, vector<1x8xf32>,
    %c1_23 = arith.constant 1 : index
    %c0_24 = arith.constant 0 : index
    %69 = vector.load %arg4[%c1_23, %c0_24] : memref<8x1xf32, #tpu.memory_space<vmem>>, vector<1x1xf32>
    tpu.vector_store %arg4[%c1_23, %c0_24], %42 {strides = array<i32>} : memref<8x1xf32, #tpu.memory_space<vmem>>, vector<1x1xf32>,
    %70 = arith.mulf %41, %42 : vector<1x1xf32>
    %71 = math.absf %70 : vector<1x1xf32>
    %72 = arith.addf %24, %71 : vector<1x1xf32>
    %73 = math.log %70 : vector<1x1xf32>
    %74 = arith.addf %26, %73 : vector<1x1xf32>
    %c2_i32 = arith.constant 2 : i32
    %75 = vector.broadcast %c2_i32 : i32 to vector<1x8xi32>
    %76 = arith.cmpi eq, %1, %75 : vector<1x8xi32>
    %cst_25 = arith.constant 0.000000e+00 : f32
    %77 = vector.broadcast %cst_25 : f32 to vector<1x8xf32>
    %78 = arith.select %76, %67, %77 : vector<1x8xi1>, vector<1x8xf32>
    %cst_26 = arith.constant dense<0.000000e+00> : vector<1xf32>
    %79 = vector.multi_reduction <add>, %78, %cst_26 [1] : vector<1x8xf32> to vector<1xf32>
    %80 = vector.shape_cast %79 : vector<1xf32> to vector<1x1xf32>
    %81 = vector.extract_strided_slice %60 {offsets = [2, 0], sizes = [1, 8], strides = [1, 1]} : vector<8x8xf32> to vector<1x8xf32>
    %c2_i32_27 = arith.constant 2 : i32
    %82 = vector.broadcast %c2_i32_27 : i32 to vector<1x8xi32>
    %83 = arith.cmpi eq, %1, %82 : vector<1x8xi32>
    %cst_28 = arith.constant 0.000000e+00 : f32
    %84 = vector.broadcast %cst_28 : f32 to vector<1x8xf32>
    %85 = arith.select %83, %81, %84 : vector<1x8xi1>, vector<1x8xf32>
    %cst_29 = arith.constant dense<0.000000e+00> : vector<1xf32>
    %86 = vector.multi_reduction <add>, %85, %cst_29 [1] : vector<1x8xf32> to vector<1xf32>
    %87 = vector.shape_cast %86 : vector<1xf32> to vector<1x1xf32>
    %88 = arith.mulf %80, %80 : vector<1x1xf32>
    %89 = arith.subf %87, %88 : vector<1x1xf32>
    %90 = math.rsqrt %89 : vector<1x1xf32>
    %c1_i32_30 = arith.constant 1 : i32
    %91 = vector.broadcast %c1_i32_30 : i32 to vector<1x8xi32>
    %92 = arith.cmpi eq, %1, %91 : vector<1x8xi32>
    %cst_31 = arith.constant 0.000000e+00 : f32
    %93 = vector.shape_cast %92 : vector<1x8xi1> to vector<1x8xi1>
    %94 = vector.broadcast %93 : vector<1x8xi1> to vector<8x8xi1>
    %95 = vector.broadcast %cst_31 : f32 to vector<8x8xf32>
    %96 = arith.select %94, %60, %95 : vector<8x8xi1>, vector<8x8xf32>
    %cst_32 = arith.constant dense<0.000000e+00> : vector<8xf32>
    %97 = vector.multi_reduction <add>, %96, %cst_32 [1] : vector<8x8xf32> to vector<8xf32>
    %98 = vector.shape_cast %97 : vector<8xf32> to vector<8x1xf32>
    %c1_i32_33 = arith.constant 1 : i32
    %99 = vector.broadcast %c1_i32_33 : i32 to vector<8x1xi32>
    %100 = arith.cmpi sge, %0, %99 : vector<8x1xi32>
    %101 = vector.broadcast %42 : vector<1x1xf32> to vector<8x1xf32>
    %102 = arith.mulf %98, %101 : vector<8x1xf32>
    %cst_34 = arith.constant 0.000000e+00 : f32
    %103 = vector.broadcast %cst_34 : f32 to vector<8x1xf32>
    %104 = arith.select %100, %102, %103 : vector<8x1xi1>, vector<8x1xf32>
    %105 = vector.broadcast %104 : vector<8x1xf32> to vector<8x8xf32>
    %106 = vector.broadcast %67 : vector<1x8xf32> to vector<8x8xf32>
    %107 = arith.mulf %105, %106 : vector<8x8xf32>
    %108 = arith.subf %60, %107 : vector<8x8xf32>
    %109 = vector.extract_strided_slice %108 {offsets = [2, 0], sizes = [1, 8], strides = [1, 1]} : vector<8x8xf32> to vector<1x8xf32>
    %c2_i32_35 = arith.constant 2 : i32
    %110 = vector.broadcast %c2_i32_35 : i32 to vector<1x8xi32>
    %111 = arith.cmpi sge, %1, %110 : vector<1x8xi32>
    %112 = vector.broadcast %90 : vector<1x1xf32> to vector<1x8xf32>
    %113 = arith.mulf %109, %112 : vector<1x8xf32>
    %cst_36 = arith.constant 0.000000e+00 : f32
    %114 = vector.broadcast %cst_36 : f32 to vector<1x8xf32>
    %115 = arith.select %111, %113, %114 : vector<1x8xi1>, vector<1x8xf32>
    %c2 = arith.constant 2 : index
    %c0_37 = arith.constant 0 : index
    %116 = vector.load %arg3[%c2, %c0_37] : memref<8x8xf32, #tpu.memory_space<vmem>>, vector<1x8xf32>
    tpu.vector_store %arg3[%c2, %c0_37], %115 {strides = array<i32>} : memref<8x8xf32, #tpu.memory_space<vmem>>, vector<1x8xf32>,
    %c2_38 = arith.constant 2 : index
    %c0_39 = arith.constant 0 : index
    %117 = vector.load %arg4[%c2_38, %c0_39] : memref<8x1xf32, #tpu.memory_space<vmem>>, vector<1x1xf32>
    tpu.vector_store %arg4[%c2_38, %c0_39], %90 {strides = array<i32>} : memref<8x1xf32, #tpu.memory_space<vmem>>, vector<1x1xf32>,
    %118 = arith.mulf %89, %90 : vector<1x1xf32>
    %119 = math.absf %118 : vector<1x1xf32>
    %120 = arith.addf %72, %119 : vector<1x1xf32>
    %121 = math.log %118 : vector<1x1xf32>
    %122 = arith.addf %74, %121 : vector<1x1xf32>
    %c3_i32 = arith.constant 3 : i32
    %123 = vector.broadcast %c3_i32 : i32 to vector<1x8xi32>
    %124 = arith.cmpi eq, %1, %123 : vector<1x8xi32>
    %cst_40 = arith.constant 0.000000e+00 : f32
    %125 = vector.broadcast %cst_40 : f32 to vector<1x8xf32>
    %126 = arith.select %124, %115, %125 : vector<1x8xi1>, vector<1x8xf32>
    %cst_41 = arith.constant dense<0.000000e+00> : vector<1xf32>
    %127 = vector.multi_reduction <add>, %126, %cst_41 [1] : vector<1x8xf32> to vector<1xf32>
    %128 = vector.shape_cast %127 : vector<1xf32> to vector<1x1xf32>
    %129 = vector.extract_strided_slice %108 {offsets = [3, 0], sizes = [1, 8], strides = [1, 1]} : vector<8x8xf32> to vector<1x8xf32>
    %c3_i32_42 = arith.constant 3 : i32
    %130 = vector.broadcast %c3_i32_42 : i32 to vector<1x8xi32>
    %131 = arith.cmpi eq, %1, %130 : vector<1x8xi32>
    %cst_43 = arith.constant 0.000000e+00 : f32
    %132 = vector.broadcast %cst_43 : f32 to vector<1x8xf32>
    %133 = arith.select %131, %129, %132 : vector<1x8xi1>, vector<1x8xf32>
    %cst_44 = arith.constant dense<0.000000e+00> : vector<1xf32>
    %134 = vector.multi_reduction <add>, %133, %cst_44 [1] : vector<1x8xf32> to vector<1xf32>
    %135 = vector.shape_cast %134 : vector<1xf32> to vector<1x1xf32>
    %136 = arith.mulf %128, %128 : vector<1x1xf32>
    %137 = arith.subf %135, %136 : vector<1x1xf32>
    %138 = math.rsqrt %137 : vector<1x1xf32>
    %c2_i32_45 = arith.constant 2 : i32
    %139 = vector.broadcast %c2_i32_45 : i32 to vector<1x8xi32>
    %140 = arith.cmpi eq, %1, %139 : vector<1x8xi32>
    %cst_46 = arith.constant 0.000000e+00 : f32
    %141 = vector.shape_cast %140 : vector<1x8xi1> to vector<1x8xi1>
    %142 = vector.broadcast %141 : vector<1x8xi1> to vector<8x8xi1>
    %143 = vector.broadcast %cst_46 : f32 to vector<8x8xf32>
    %144 = arith.select %142, %108, %143 : vector<8x8xi1>, vector<8x8xf32>
    %cst_47 = arith.constant dense<0.000000e+00> : vector<8xf32>
    %145 = vector.multi_reduction <add>, %144, %cst_47 [1] : vector<8x8xf32> to vector<8xf32>
    %146 = vector.shape_cast %145 : vector<8xf32> to vector<8x1xf32>
    %c2_i32_48 = arith.constant 2 : i32
    %147 = vector.broadcast %c2_i32_48 : i32 to vector<8x1xi32>
    %148 = arith.cmpi sge, %0, %147 : vector<8x1xi32>
    %149 = vector.broadcast %90 : vector<1x1xf32> to vector<8x1xf32>
    %150 = arith.mulf %146, %149 : vector<8x1xf32>
    %cst_49 = arith.constant 0.000000e+00 : f32
    %151 = vector.broadcast %cst_49 : f32 to vector<8x1xf32>
    %152 = arith.select %148, %150, %151 : vector<8x1xi1>, vector<8x1xf32>
    %153 = vector.broadcast %152 : vector<8x1xf32> to vector<8x8xf32>
    %154 = vector.broadcast %115 : vector<1x8xf32> to vector<8x8xf32>
    %155 = arith.mulf %153, %154 : vector<8x8xf32>
    %156 = arith.subf %108, %155 : vector<8x8xf32>
    %157 = vector.extract_strided_slice %156 {offsets = [3, 0], sizes = [1, 8], strides = [1, 1]} : vector<8x8xf32> to vector<1x8xf32>
    %c3_i32_50 = arith.constant 3 : i32
    %158 = vector.broadcast %c3_i32_50 : i32 to vector<1x8xi32>
    %159 = arith.cmpi sge, %1, %158 : vector<1x8xi32>
    %160 = vector.broadcast %138 : vector<1x1xf32> to vector<1x8xf32>
    %161 = arith.mulf %157, %160 : vector<1x8xf32>
    %cst_51 = arith.constant 0.000000e+00 : f32
    %162 = vector.broadcast %cst_51 : f32 to vector<1x8xf32>
    %163 = arith.select %159, %161, %162 : vector<1x8xi1>, vector<1x8xf32>
    %c3 = arith.constant 3 : index
    %c0_52 = arith.constant 0 : index
    %164 = vector.load %arg3[%c3, %c0_52] : memref<8x8xf32, #tpu.memory_space<vmem>>, vector<1x8xf32>
    tpu.vector_store %arg3[%c3, %c0_52], %163 {strides = array<i32>} : memref<8x8xf32, #tpu.memory_space<vmem>>, vector<1x8xf32>,
    %c3_53 = arith.constant 3 : index
    %c0_54 = arith.constant 0 : index
    %165 = vector.load %arg4[%c3_53, %c0_54] : memref<8x1xf32, #tpu.memory_space<vmem>>, vector<1x1xf32>
    tpu.vector_store %arg4[%c3_53, %c0_54], %138 {strides = array<i32>} : memref<8x1xf32, #tpu.memory_space<vmem>>, vector<1x1xf32>,
    %166 = arith.mulf %137, %138 : vector<1x1xf32>
    %167 = math.absf %166 : vector<1x1xf32>
    %168 = arith.addf %120, %167 : vector<1x1xf32>
    %169 = math.log %166 : vector<1x1xf32>
    %170 = arith.addf %122, %169 : vector<1x1xf32>
    %c4_i32 = arith.constant 4 : i32
    %171 = vector.broadcast %c4_i32 : i32 to vector<1x8xi32>
    %172 = arith.cmpi eq, %1, %171 : vector<1x8xi32>
    %cst_55 = arith.constant 0.000000e+00 : f32
    %173 = vector.broadcast %cst_55 : f32 to vector<1x8xf32>
    %174 = arith.select %172, %163, %173 : vector<1x8xi1>, vector<1x8xf32>
    %cst_56 = arith.constant dense<0.000000e+00> : vector<1xf32>
    %175 = vector.multi_reduction <add>, %174, %cst_56 [1] : vector<1x8xf32> to vector<1xf32>
    %176 = vector.shape_cast %175 : vector<1xf32> to vector<1x1xf32>
    %177 = vector.extract_strided_slice %156 {offsets = [4, 0], sizes = [1, 8], strides = [1, 1]} : vector<8x8xf32> to vector<1x8xf32>
    %c4_i32_57 = arith.constant 4 : i32
    %178 = vector.broadcast %c4_i32_57 : i32 to vector<1x8xi32>
    %179 = arith.cmpi eq, %1, %178 : vector<1x8xi32>
    %cst_58 = arith.constant 0.000000e+00 : f32
    %180 = vector.broadcast %cst_58 : f32 to vector<1x8xf32>
    %181 = arith.select %179, %177, %180 : vector<1x8xi1>, vector<1x8xf32>
    %cst_59 = arith.constant dense<0.000000e+00> : vector<1xf32>
    %182 = vector.multi_reduction <add>, %181, %cst_59 [1] : vector<1x8xf32> to vector<1xf32>
    %183 = vector.shape_cast %182 : vector<1xf32> to vector<1x1xf32>
    %184 = arith.mulf %176, %176 : vector<1x1xf32>
    %185 = arith.subf %183, %184 : vector<1x1xf32>
    %186 = math.rsqrt %185 : vector<1x1xf32>
    %c3_i32_60 = arith.constant 3 : i32
    %187 = vector.broadcast %c3_i32_60 : i32 to vector<1x8xi32>
    %188 = arith.cmpi eq, %1, %187 : vector<1x8xi32>
    %cst_61 = arith.constant 0.000000e+00 : f32
    %189 = vector.shape_cast %188 : vector<1x8xi1> to vector<1x8xi1>
    %190 = vector.broadcast %189 : vector<1x8xi1> to vector<8x8xi1>
    %191 = vector.broadcast %cst_61 : f32 to vector<8x8xf32>
    %192 = arith.select %190, %156, %191 : vector<8x8xi1>, vector<8x8xf32>
    %cst_62 = arith.constant dense<0.000000e+00> : vector<8xf32>
    %193 = vector.multi_reduction <add>, %192, %cst_62 [1] : vector<8x8xf32> to vector<8xf32>
    %194 = vector.shape_cast %193 : vector<8xf32> to vector<8x1xf32>
    %c3_i32_63 = arith.constant 3 : i32
    %195 = vector.broadcast %c3_i32_63 : i32 to vector<8x1xi32>
    %196 = arith.cmpi sge, %0, %195 : vector<8x1xi32>
    %197 = vector.broadcast %138 : vector<1x1xf32> to vector<8x1xf32>
    %198 = arith.mulf %194, %197 : vector<8x1xf32>
    %cst_64 = arith.constant 0.000000e+00 : f32
    %199 = vector.broadcast %cst_64 : f32 to vector<8x1xf32>
    %200 = arith.select %196, %198, %199 : vector<8x1xi1>, vector<8x1xf32>
    %201 = vector.broadcast %200 : vector<8x1xf32> to vector<8x8xf32>
    %202 = vector.broadcast %163 : vector<1x8xf32> to vector<8x8xf32>
    %203 = arith.mulf %201, %202 : vector<8x8xf32>
    %204 = arith.subf %156, %203 : vector<8x8xf32>
    %205 = vector.extract_strided_slice %204 {offsets = [4, 0], sizes = [1, 8], strides = [1, 1]} : vector<8x8xf32> to vector<1x8xf32>
    %c4_i32_65 = arith.constant 4 : i32
    %206 = vector.broadcast %c4_i32_65 : i32 to vector<1x8xi32>
    %207 = arith.cmpi sge, %1, %206 : vector<1x8xi32>
    %208 = vector.broadcast %186 : vector<1x1xf32> to vector<1x8xf32>
    %209 = arith.mulf %205, %208 : vector<1x8xf32>
    %cst_66 = arith.constant 0.000000e+00 : f32
    %210 = vector.broadcast %cst_66 : f32 to vector<1x8xf32>
    %211 = arith.select %207, %209, %210 : vector<1x8xi1>, vector<1x8xf32>
    %c4 = arith.constant 4 : index
    %c0_67 = arith.constant 0 : index
    %212 = vector.load %arg3[%c4, %c0_67] : memref<8x8xf32, #tpu.memory_space<vmem>>, vector<1x8xf32>
    tpu.vector_store %arg3[%c4, %c0_67], %211 {strides = array<i32>} : memref<8x8xf32, #tpu.memory_space<vmem>>, vector<1x8xf32>,
    %c4_68 = arith.constant 4 : index
    %c0_69 = arith.constant 0 : index
    %213 = vector.load %arg4[%c4_68, %c0_69] : memref<8x1xf32, #tpu.memory_space<vmem>>, vector<1x1xf32>
    tpu.vector_store %arg4[%c4_68, %c0_69], %186 {strides = array<i32>} : memref<8x1xf32, #tpu.memory_space<vmem>>, vector<1x1xf32>,
    %214 = arith.mulf %185, %186 : vector<1x1xf32>
    %215 = math.absf %214 : vector<1x1xf32>
    %216 = arith.addf %168, %215 : vector<1x1xf32>
    %217 = math.log %214 : vector<1x1xf32>
    %218 = arith.addf %170, %217 : vector<1x1xf32>
    %c5_i32 = arith.constant 5 : i32
    %219 = vector.broadcast %c5_i32 : i32 to vector<1x8xi32>
    %220 = arith.cmpi eq, %1, %219 : vector<1x8xi32>
    %cst_70 = arith.constant 0.000000e+00 : f32
    %221 = vector.broadcast %cst_70 : f32 to vector<1x8xf32>
    %222 = arith.select %220, %211, %221 : vector<1x8xi1>, vector<1x8xf32>
    %cst_71 = arith.constant dense<0.000000e+00> : vector<1xf32>
    %223 = vector.multi_reduction <add>, %222, %cst_71 [1] : vector<1x8xf32> to vector<1xf32>
    %224 = vector.shape_cast %223 : vector<1xf32> to vector<1x1xf32>
    %225 = vector.extract_strided_slice %204 {offsets = [5, 0], sizes = [1, 8], strides = [1, 1]} : vector<8x8xf32> to vector<1x8xf32>
    %c5_i32_72 = arith.constant 5 : i32
    %226 = vector.broadcast %c5_i32_72 : i32 to vector<1x8xi32>
    %227 = arith.cmpi eq, %1, %226 : vector<1x8xi32>
    %cst_73 = arith.constant 0.000000e+00 : f32
    %228 = vector.broadcast %cst_73 : f32 to vector<1x8xf32>
    %229 = arith.select %227, %225, %228 : vector<1x8xi1>, vector<1x8xf32>
    %cst_74 = arith.constant dense<0.000000e+00> : vector<1xf32>
    %230 = vector.multi_reduction <add>, %229, %cst_74 [1] : vector<1x8xf32> to vector<1xf32>
    %231 = vector.shape_cast %230 : vector<1xf32> to vector<1x1xf32>
    %232 = arith.mulf %224, %224 : vector<1x1xf32>
    %233 = arith.subf %231, %232 : vector<1x1xf32>
    %234 = math.rsqrt %233 : vector<1x1xf32>
    %c4_i32_75 = arith.constant 4 : i32
    %235 = vector.broadcast %c4_i32_75 : i32 to vector<1x8xi32>
    %236 = arith.cmpi eq, %1, %235 : vector<1x8xi32>
    %cst_76 = arith.constant 0.000000e+00 : f32
    %237 = vector.shape_cast %236 : vector<1x8xi1> to vector<1x8xi1>
    %238 = vector.broadcast %237 : vector<1x8xi1> to vector<8x8xi1>
    %239 = vector.broadcast %cst_76 : f32 to vector<8x8xf32>
    %240 = arith.select %238, %204, %239 : vector<8x8xi1>, vector<8x8xf32>
    %cst_77 = arith.constant dense<0.000000e+00> : vector<8xf32>
    %241 = vector.multi_reduction <add>, %240, %cst_77 [1] : vector<8x8xf32> to vector<8xf32>
    %242 = vector.shape_cast %241 : vector<8xf32> to vector<8x1xf32>
    %c4_i32_78 = arith.constant 4 : i32
    %243 = vector.broadcast %c4_i32_78 : i32 to vector<8x1xi32>
    %244 = arith.cmpi sge, %0, %243 : vector<8x1xi32>
    %245 = vector.broadcast %186 : vector<1x1xf32> to vector<8x1xf32>
    %246 = arith.mulf %242, %245 : vector<8x1xf32>
    %cst_79 = arith.constant 0.000000e+00 : f32
    %247 = vector.broadcast %cst_79 : f32 to vector<8x1xf32>
    %248 = arith.select %244, %246, %247 : vector<8x1xi1>, vector<8x1xf32>
    %249 = vector.broadcast %248 : vector<8x1xf32> to vector<8x8xf32>
    %250 = vector.broadcast %211 : vector<1x8xf32> to vector<8x8xf32>
    %251 = arith.mulf %249, %250 : vector<8x8xf32>
    %252 = arith.subf %204, %251 : vector<8x8xf32>
    %253 = vector.extract_strided_slice %252 {offsets = [5, 0], sizes = [1, 8], strides = [1, 1]} : vector<8x8xf32> to vector<1x8xf32>
    %c5_i32_80 = arith.constant 5 : i32
    %254 = vector.broadcast %c5_i32_80 : i32 to vector<1x8xi32>
    %255 = arith.cmpi sge, %1, %254 : vector<1x8xi32>
    %256 = vector.broadcast %234 : vector<1x1xf32> to vector<1x8xf32>
    %257 = arith.mulf %253, %256 : vector<1x8xf32>
    %cst_81 = arith.constant 0.000000e+00 : f32
    %258 = vector.broadcast %cst_81 : f32 to vector<1x8xf32>
    %259 = arith.select %255, %257, %258 : vector<1x8xi1>, vector<1x8xf32>
    %c5 = arith.constant 5 : index
    %c0_82 = arith.constant 0 : index
    %260 = vector.load %arg3[%c5, %c0_82] : memref<8x8xf32, #tpu.memory_space<vmem>>, vector<1x8xf32>
    tpu.vector_store %arg3[%c5, %c0_82], %259 {strides = array<i32>} : memref<8x8xf32, #tpu.memory_space<vmem>>, vector<1x8xf32>,
    %c5_83 = arith.constant 5 : index
    %c0_84 = arith.constant 0 : index
    %261 = vector.load %arg4[%c5_83, %c0_84] : memref<8x1xf32, #tpu.memory_space<vmem>>, vector<1x1xf32>
    tpu.vector_store %arg4[%c5_83, %c0_84], %234 {strides = array<i32>} : memref<8x1xf32, #tpu.memory_space<vmem>>, vector<1x1xf32>,
    %262 = arith.mulf %233, %234 : vector<1x1xf32>
    %263 = math.absf %262 : vector<1x1xf32>
    %264 = arith.addf %216, %263 : vector<1x1xf32>
    %265 = math.log %262 : vector<1x1xf32>
    %266 = arith.addf %218, %265 : vector<1x1xf32>
    %c6_i32 = arith.constant 6 : i32
    %267 = vector.broadcast %c6_i32 : i32 to vector<1x8xi32>
    %268 = arith.cmpi eq, %1, %267 : vector<1x8xi32>
    %cst_85 = arith.constant 0.000000e+00 : f32
    %269 = vector.broadcast %cst_85 : f32 to vector<1x8xf32>
    %270 = arith.select %268, %259, %269 : vector<1x8xi1>, vector<1x8xf32>
    %cst_86 = arith.constant dense<0.000000e+00> : vector<1xf32>
    %271 = vector.multi_reduction <add>, %270, %cst_86 [1] : vector<1x8xf32> to vector<1xf32>
    %272 = vector.shape_cast %271 : vector<1xf32> to vector<1x1xf32>
    %273 = vector.extract_strided_slice %252 {offsets = [6, 0], sizes = [1, 8], strides = [1, 1]} : vector<8x8xf32> to vector<1x8xf32>
    %c6_i32_87 = arith.constant 6 : i32
    %274 = vector.broadcast %c6_i32_87 : i32 to vector<1x8xi32>
    %275 = arith.cmpi eq, %1, %274 : vector<1x8xi32>
    %cst_88 = arith.constant 0.000000e+00 : f32
    %276 = vector.broadcast %cst_88 : f32 to vector<1x8xf32>
    %277 = arith.select %275, %273, %276 : vector<1x8xi1>, vector<1x8xf32>
    %cst_89 = arith.constant dense<0.000000e+00> : vector<1xf32>
    %278 = vector.multi_reduction <add>, %277, %cst_89 [1] : vector<1x8xf32> to vector<1xf32>
    %279 = vector.shape_cast %278 : vector<1xf32> to vector<1x1xf32>
    %280 = arith.mulf %272, %272 : vector<1x1xf32>
    %281 = arith.subf %279, %280 : vector<1x1xf32>
    %282 = math.rsqrt %281 : vector<1x1xf32>
    %c5_i32_90 = arith.constant 5 : i32
    %283 = vector.broadcast %c5_i32_90 : i32 to vector<1x8xi32>
    %284 = arith.cmpi eq, %1, %283 : vector<1x8xi32>
    %cst_91 = arith.constant 0.000000e+00 : f32
    %285 = vector.shape_cast %284 : vector<1x8xi1> to vector<1x8xi1>
    %286 = vector.broadcast %285 : vector<1x8xi1> to vector<8x8xi1>
    %287 = vector.broadcast %cst_91 : f32 to vector<8x8xf32>
    %288 = arith.select %286, %252, %287 : vector<8x8xi1>, vector<8x8xf32>
    %cst_92 = arith.constant dense<0.000000e+00> : vector<8xf32>
    %289 = vector.multi_reduction <add>, %288, %cst_92 [1] : vector<8x8xf32> to vector<8xf32>
    %290 = vector.shape_cast %289 : vector<8xf32> to vector<8x1xf32>
    %c5_i32_93 = arith.constant 5 : i32
    %291 = vector.broadcast %c5_i32_93 : i32 to vector<8x1xi32>
    %292 = arith.cmpi sge, %0, %291 : vector<8x1xi32>
    %293 = vector.broadcast %234 : vector<1x1xf32> to vector<8x1xf32>
    %294 = arith.mulf %290, %293 : vector<8x1xf32>
    %cst_94 = arith.constant 0.000000e+00 : f32
    %295 = vector.broadcast %cst_94 : f32 to vector<8x1xf32>
    %296 = arith.select %292, %294, %295 : vector<8x1xi1>, vector<8x1xf32>
    %297 = vector.broadcast %296 : vector<8x1xf32> to vector<8x8xf32>
    %298 = vector.broadcast %259 : vector<1x8xf32> to vector<8x8xf32>
    %299 = arith.mulf %297, %298 : vector<8x8xf32>
    %300 = arith.subf %252, %299 : vector<8x8xf32>
    %301 = vector.extract_strided_slice %300 {offsets = [6, 0], sizes = [1, 8], strides = [1, 1]} : vector<8x8xf32> to vector<1x8xf32>
    %c6_i32_95 = arith.constant 6 : i32
    %302 = vector.broadcast %c6_i32_95 : i32 to vector<1x8xi32>
    %303 = arith.cmpi sge, %1, %302 : vector<1x8xi32>
    %304 = vector.broadcast %282 : vector<1x1xf32> to vector<1x8xf32>
    %305 = arith.mulf %301, %304 : vector<1x8xf32>
    %cst_96 = arith.constant 0.000000e+00 : f32
    %306 = vector.broadcast %cst_96 : f32 to vector<1x8xf32>
    %307 = arith.select %303, %305, %306 : vector<1x8xi1>, vector<1x8xf32>
    %c6 = arith.constant 6 : index
    %c0_97 = arith.constant 0 : index
    %308 = vector.load %arg3[%c6, %c0_97] : memref<8x8xf32, #tpu.memory_space<vmem>>, vector<1x8xf32>
    tpu.vector_store %arg3[%c6, %c0_97], %307 {strides = array<i32>} : memref<8x8xf32, #tpu.memory_space<vmem>>, vector<1x8xf32>,
    %c6_98 = arith.constant 6 : index
    %c0_99 = arith.constant 0 : index
    %309 = vector.load %arg4[%c6_98, %c0_99] : memref<8x1xf32, #tpu.memory_space<vmem>>, vector<1x1xf32>
    tpu.vector_store %arg4[%c6_98, %c0_99], %282 {strides = array<i32>} : memref<8x1xf32, #tpu.memory_space<vmem>>, vector<1x1xf32>,
    %310 = arith.mulf %281, %282 : vector<1x1xf32>
    %311 = math.absf %310 : vector<1x1xf32>
    %312 = arith.addf %264, %311 : vector<1x1xf32>
    %313 = math.log %310 : vector<1x1xf32>
    %314 = arith.addf %266, %313 : vector<1x1xf32>
    %c7_i32 = arith.constant 7 : i32
    %315 = vector.broadcast %c7_i32 : i32 to vector<1x8xi32>
    %316 = arith.cmpi eq, %1, %315 : vector<1x8xi32>
    %cst_100 = arith.constant 0.000000e+00 : f32
    %317 = vector.broadcast %cst_100 : f32 to vector<1x8xf32>
    %318 = arith.select %316, %307, %317 : vector<1x8xi1>, vector<1x8xf32>
    %cst_101 = arith.constant dense<0.000000e+00> : vector<1xf32>
    %319 = vector.multi_reduction <add>, %318, %cst_101 [1] : vector<1x8xf32> to vector<1xf32>
    %320 = vector.shape_cast %319 : vector<1xf32> to vector<1x1xf32>
    %321 = vector.extract_strided_slice %300 {offsets = [7, 0], sizes = [1, 8], strides = [1, 1]} : vector<8x8xf32> to vector<1x8xf32>
    %c7_i32_102 = arith.constant 7 : i32
    %322 = vector.broadcast %c7_i32_102 : i32 to vector<1x8xi32>
    %323 = arith.cmpi eq, %1, %322 : vector<1x8xi32>
    %cst_103 = arith.constant 0.000000e+00 : f32
    %324 = vector.broadcast %cst_103 : f32 to vector<1x8xf32>
    %325 = arith.select %323, %321, %324 : vector<1x8xi1>, vector<1x8xf32>
    %cst_104 = arith.constant dense<0.000000e+00> : vector<1xf32>
    %326 = vector.multi_reduction <add>, %325, %cst_104 [1] : vector<1x8xf32> to vector<1xf32>
    %327 = vector.shape_cast %326 : vector<1xf32> to vector<1x1xf32>
    %328 = arith.mulf %320, %320 : vector<1x1xf32>
    %329 = arith.subf %327, %328 : vector<1x1xf32>
    %330 = math.rsqrt %329 : vector<1x1xf32>
    %c6_i32_105 = arith.constant 6 : i32
    %331 = vector.broadcast %c6_i32_105 : i32 to vector<1x8xi32>
    %332 = arith.cmpi eq, %1, %331 : vector<1x8xi32>
    %cst_106 = arith.constant 0.000000e+00 : f32
    %333 = vector.shape_cast %332 : vector<1x8xi1> to vector<1x8xi1>
    %334 = vector.broadcast %333 : vector<1x8xi1> to vector<8x8xi1>
    %335 = vector.broadcast %cst_106 : f32 to vector<8x8xf32>
    %336 = arith.select %334, %300, %335 : vector<8x8xi1>, vector<8x8xf32>
    %cst_107 = arith.constant dense<0.000000e+00> : vector<8xf32>
    %337 = vector.multi_reduction <add>, %336, %cst_107 [1] : vector<8x8xf32> to vector<8xf32>
    %338 = vector.shape_cast %337 : vector<8xf32> to vector<8x1xf32>
    %c6_i32_108 = arith.constant 6 : i32
    %339 = vector.broadcast %c6_i32_108 : i32 to vector<8x1xi32>
    %340 = arith.cmpi sge, %0, %339 : vector<8x1xi32>
    %341 = vector.broadcast %282 : vector<1x1xf32> to vector<8x1xf32>
    %342 = arith.mulf %338, %341 : vector<8x1xf32>
    %cst_109 = arith.constant 0.000000e+00 : f32
    %343 = vector.broadcast %cst_109 : f32 to vector<8x1xf32>
    %344 = arith.select %340, %342, %343 : vector<8x1xi1>, vector<8x1xf32>
    %345 = vector.broadcast %344 : vector<8x1xf32> to vector<8x8xf32>
    %346 = vector.broadcast %307 : vector<1x8xf32> to vector<8x8xf32>
    %347 = arith.mulf %345, %346 : vector<8x8xf32>
    %348 = arith.subf %300, %347 : vector<8x8xf32>
    %349 = vector.extract_strided_slice %348 {offsets = [7, 0], sizes = [1, 8], strides = [1, 1]} : vector<8x8xf32> to vector<1x8xf32>
    %c7_i32_110 = arith.constant 7 : i32
    %350 = vector.broadcast %c7_i32_110 : i32 to vector<1x8xi32>
    %351 = arith.cmpi sge, %1, %350 : vector<1x8xi32>
    %352 = vector.broadcast %330 : vector<1x1xf32> to vector<1x8xf32>
    %353 = arith.mulf %349, %352 : vector<1x8xf32>
    %cst_111 = arith.constant 0.000000e+00 : f32
    %354 = vector.broadcast %cst_111 : f32 to vector<1x8xf32>
    %355 = arith.select %351, %353, %354 : vector<1x8xi1>, vector<1x8xf32>
    %c7 = arith.constant 7 : index
    %c0_112 = arith.constant 0 : index
    %356 = vector.load %arg3[%c7, %c0_112] : memref<8x8xf32, #tpu.memory_space<vmem>>, vector<1x8xf32>
    tpu.vector_store %arg3[%c7, %c0_112], %355 {strides = array<i32>} : memref<8x8xf32, #tpu.memory_space<vmem>>, vector<1x8xf32>,
    %c7_113 = arith.constant 7 : index
    %c0_114 = arith.constant 0 : index
    %357 = vector.load %arg4[%c7_113, %c0_114] : memref<8x1xf32, #tpu.memory_space<vmem>>, vector<1x1xf32>
    tpu.vector_store %arg4[%c7_113, %c0_114], %330 {strides = array<i32>} : memref<8x1xf32, #tpu.memory_space<vmem>>, vector<1x1xf32>,
    %358 = arith.mulf %329, %330 : vector<1x1xf32>
    %359 = math.absf %358 : vector<1x1xf32>
    %360 = arith.addf %312, %359 : vector<1x1xf32>
    %361 = math.log %358 : vector<1x1xf32>
    %362 = arith.addf %314, %361 : vector<1x1xf32>
    %cst_115 = arith.constant 0.000000e+00 : f32
    %363 = vector.broadcast %cst_115 : f32 to vector<8x8xf32>
    %cst_116 = arith.constant 0.000000e+00 : f32
    %364 = vector.broadcast %cst_116 : f32 to vector<1x1xf32>
    %c7_117 = arith.constant 7 : index
    %c0_118 = arith.constant 0 : index
    %365 = vector.load %arg3[%c7_117, %c0_118] : memref<8x8xf32, #tpu.memory_space<vmem>>, vector<1x8xf32>
    %c7_119 = arith.constant 7 : index
    %c0_120 = arith.constant 0 : index
    %366 = vector.load %arg4[%c7_119, %c0_120] : memref<8x1xf32, #tpu.memory_space<vmem>>, vector<1x1xf32>
    %cst_121 = arith.constant dense<0.000000e+00> : vector<1x8xf32>
    %367 = tpu.matmul %365, %363, %cst_121 {dimension_numbers = #tpu.dot_dimension_numbers<[1], [0], [0], [1], [0, 0, 1, 1], [], []>} : vector<1x8xf32>, vector<8x8xf32>, vector<1x8xf32> -> vector<1x8xf32>
    %c7_i32_122 = arith.constant 7 : i32
    %368 = vector.broadcast %c7_i32_122 : i32 to vector<1x8xi32>
    %369 = arith.cmpi eq, %1, %368 : vector<1x8xi32>
    %370 = arith.extui %369 : vector<1x8xi1> to vector<1x8xi32>
    %371 = arith.sitofp %370 : vector<1x8xi32> to vector<1x8xf32>
    %372 = arith.subf %371, %367 : vector<1x8xf32>
    %373 = vector.broadcast %366 : vector<1x1xf32> to vector<1x8xf32>
    %374 = arith.mulf %372, %373 : vector<1x8xf32>
    %c7_i32_123 = arith.constant 7 : i32
    %375 = vector.broadcast %c7_i32_123 : i32 to vector<8x1xi32>
    %376 = arith.cmpi eq, %0, %375 : vector<8x1xi32>
    %377 = vector.shape_cast %376 : vector<8x1xi1> to vector<8x1xi1>
    %378 = vector.broadcast %377 : vector<8x1xi1> to vector<8x8xi1>
    %379 = vector.shape_cast %374 : vector<1x8xf32> to vector<1x8xf32>
    %380 = vector.broadcast %379 : vector<1x8xf32> to vector<8x8xf32>
    %381 = arith.select %378, %380, %363 : vector<8x8xi1>, vector<8x8xf32>
    %382 = arith.mulf %374, %374 : vector<1x8xf32>
    %cst_124 = arith.constant dense<0.000000e+00> : vector<1xf32>
    %383 = vector.multi_reduction <add>, %382, %cst_124 [1] : vector<1x8xf32> to vector<1xf32>
    %384 = vector.shape_cast %383 : vector<1xf32> to vector<1x1xf32>
    %385 = arith.addf %364, %384 : vector<1x1xf32>
    %c6_125 = arith.constant 6 : index
    %c0_126 = arith.constant 0 : index
    %386 = vector.load %arg3[%c6_125, %c0_126] : memref<8x8xf32, #tpu.memory_space<vmem>>, vector<1x8xf32>
    %c6_127 = arith.constant 6 : index
    %c0_128 = arith.constant 0 : index
    %387 = vector.load %arg4[%c6_127, %c0_128] : memref<8x1xf32, #tpu.memory_space<vmem>>, vector<1x1xf32>
    %cst_129 = arith.constant dense<0.000000e+00> : vector<1x8xf32>
    %388 = tpu.matmul %386, %381, %cst_129 {dimension_numbers = #tpu.dot_dimension_numbers<[1], [0], [0], [1], [0, 0, 1, 1], [], []>} : vector<1x8xf32>, vector<8x8xf32>, vector<1x8xf32> -> vector<1x8xf32>
    %c6_i32_130 = arith.constant 6 : i32
    %389 = vector.broadcast %c6_i32_130 : i32 to vector<1x8xi32>
    %390 = arith.cmpi eq, %1, %389 : vector<1x8xi32>
    %391 = arith.extui %390 : vector<1x8xi1> to vector<1x8xi32>
    %392 = arith.sitofp %391 : vector<1x8xi32> to vector<1x8xf32>
    %393 = arith.subf %392, %388 : vector<1x8xf32>
    %394 = vector.broadcast %387 : vector<1x1xf32> to vector<1x8xf32>
    %395 = arith.mulf %393, %394 : vector<1x8xf32>
    %c6_i32_131 = arith.constant 6 : i32
    %396 = vector.broadcast %c6_i32_131 : i32 to vector<8x1xi32>
    %397 = arith.cmpi eq, %0, %396 : vector<8x1xi32>
    %398 = vector.shape_cast %397 : vector<8x1xi1> to vector<8x1xi1>
    %399 = vector.broadcast %398 : vector<8x1xi1> to vector<8x8xi1>
    %400 = vector.shape_cast %395 : vector<1x8xf32> to vector<1x8xf32>
    %401 = vector.broadcast %400 : vector<1x8xf32> to vector<8x8xf32>
    %402 = arith.select %399, %401, %381 : vector<8x8xi1>, vector<8x8xf32>
    %403 = arith.mulf %395, %395 : vector<1x8xf32>
    %cst_132 = arith.constant dense<0.000000e+00> : vector<1xf32>
    %404 = vector.multi_reduction <add>, %403, %cst_132 [1] : vector<1x8xf32> to vector<1xf32>
    %405 = vector.shape_cast %404 : vector<1xf32> to vector<1x1xf32>
    %406 = arith.addf %385, %405 : vector<1x1xf32>
    %c5_133 = arith.constant 5 : index
    %c0_134 = arith.constant 0 : index
    %407 = vector.load %arg3[%c5_133, %c0_134] : memref<8x8xf32, #tpu.memory_space<vmem>>, vector<1x8xf32>
    %c5_135 = arith.constant 5 : index
    %c0_136 = arith.constant 0 : index
    %408 = vector.load %arg4[%c5_135, %c0_136] : memref<8x1xf32, #tpu.memory_space<vmem>>, vector<1x1xf32>
    %cst_137 = arith.constant dense<0.000000e+00> : vector<1x8xf32>
    %409 = tpu.matmul %407, %402, %cst_137 {dimension_numbers = #tpu.dot_dimension_numbers<[1], [0], [0], [1], [0, 0, 1, 1], [], []>} : vector<1x8xf32>, vector<8x8xf32>, vector<1x8xf32> -> vector<1x8xf32>
    %c5_i32_138 = arith.constant 5 : i32
    %410 = vector.broadcast %c5_i32_138 : i32 to vector<1x8xi32>
    %411 = arith.cmpi eq, %1, %410 : vector<1x8xi32>
    %412 = arith.extui %411 : vector<1x8xi1> to vector<1x8xi32>
    %413 = arith.sitofp %412 : vector<1x8xi32> to vector<1x8xf32>
    %414 = arith.subf %413, %409 : vector<1x8xf32>
    %415 = vector.broadcast %408 : vector<1x1xf32> to vector<1x8xf32>
    %416 = arith.mulf %414, %415 : vector<1x8xf32>
    %c5_i32_139 = arith.constant 5 : i32
    %417 = vector.broadcast %c5_i32_139 : i32 to vector<8x1xi32>
    %418 = arith.cmpi eq, %0, %417 : vector<8x1xi32>
    %419 = vector.shape_cast %418 : vector<8x1xi1> to vector<8x1xi1>
    %420 = vector.broadcast %419 : vector<8x1xi1> to vector<8x8xi1>
    %421 = vector.shape_cast %416 : vector<1x8xf32> to vector<1x8xf32>
    %422 = vector.broadcast %421 : vector<1x8xf32> to vector<8x8xf32>
    %423 = arith.select %420, %422, %402 : vector<8x8xi1>, vector<8x8xf32>
    %424 = arith.mulf %416, %416 : vector<1x8xf32>
    %cst_140 = arith.constant dense<0.000000e+00> : vector<1xf32>
    %425 = vector.multi_reduction <add>, %424, %cst_140 [1] : vector<1x8xf32> to vector<1xf32>
    %426 = vector.shape_cast %425 : vector<1xf32> to vector<1x1xf32>
    %427 = arith.addf %406, %426 : vector<1x1xf32>
    %c4_141 = arith.constant 4 : index
    %c0_142 = arith.constant 0 : index
    %428 = vector.load %arg3[%c4_141, %c0_142] : memref<8x8xf32, #tpu.memory_space<vmem>>, vector<1x8xf32>
    %c4_143 = arith.constant 4 : index
    %c0_144 = arith.constant 0 : index
    %429 = vector.load %arg4[%c4_143, %c0_144] : memref<8x1xf32, #tpu.memory_space<vmem>>, vector<1x1xf32>
    %cst_145 = arith.constant dense<0.000000e+00> : vector<1x8xf32>
    %430 = tpu.matmul %428, %423, %cst_145 {dimension_numbers = #tpu.dot_dimension_numbers<[1], [0], [0], [1], [0, 0, 1, 1], [], []>} : vector<1x8xf32>, vector<8x8xf32>, vector<1x8xf32> -> vector<1x8xf32>
    %c4_i32_146 = arith.constant 4 : i32
    %431 = vector.broadcast %c4_i32_146 : i32 to vector<1x8xi32>
    %432 = arith.cmpi eq, %1, %431 : vector<1x8xi32>
    %433 = arith.extui %432 : vector<1x8xi1> to vector<1x8xi32>
    %434 = arith.sitofp %433 : vector<1x8xi32> to vector<1x8xf32>
    %435 = arith.subf %434, %430 : vector<1x8xf32>
    %436 = vector.broadcast %429 : vector<1x1xf32> to vector<1x8xf32>
    %437 = arith.mulf %435, %436 : vector<1x8xf32>
    %c4_i32_147 = arith.constant 4 : i32
    %438 = vector.broadcast %c4_i32_147 : i32 to vector<8x1xi32>
    %439 = arith.cmpi eq, %0, %438 : vector<8x1xi32>
    %440 = vector.shape_cast %439 : vector<8x1xi1> to vector<8x1xi1>
    %441 = vector.broadcast %440 : vector<8x1xi1> to vector<8x8xi1>
    %442 = vector.shape_cast %437 : vector<1x8xf32> to vector<1x8xf32>
    %443 = vector.broadcast %442 : vector<1x8xf32> to vector<8x8xf32>
    %444 = arith.select %441, %443, %423 : vector<8x8xi1>, vector<8x8xf32>
    %445 = arith.mulf %437, %437 : vector<1x8xf32>
    %cst_148 = arith.constant dense<0.000000e+00> : vector<1xf32>
    %446 = vector.multi_reduction <add>, %445, %cst_148 [1] : vector<1x8xf32> to vector<1xf32>
    %447 = vector.shape_cast %446 : vector<1xf32> to vector<1x1xf32>
    %448 = arith.addf %427, %447 : vector<1x1xf32>
    %c3_149 = arith.constant 3 : index
    %c0_150 = arith.constant 0 : index
    %449 = vector.load %arg3[%c3_149, %c0_150] : memref<8x8xf32, #tpu.memory_space<vmem>>, vector<1x8xf32>
    %c3_151 = arith.constant 3 : index
    %c0_152 = arith.constant 0 : index
    %450 = vector.load %arg4[%c3_151, %c0_152] : memref<8x1xf32, #tpu.memory_space<vmem>>, vector<1x1xf32>
    %cst_153 = arith.constant dense<0.000000e+00> : vector<1x8xf32>
    %451 = tpu.matmul %449, %444, %cst_153 {dimension_numbers = #tpu.dot_dimension_numbers<[1], [0], [0], [1], [0, 0, 1, 1], [], []>} : vector<1x8xf32>, vector<8x8xf32>, vector<1x8xf32> -> vector<1x8xf32>
    %c3_i32_154 = arith.constant 3 : i32
    %452 = vector.broadcast %c3_i32_154 : i32 to vector<1x8xi32>
    %453 = arith.cmpi eq, %1, %452 : vector<1x8xi32>
    %454 = arith.extui %453 : vector<1x8xi1> to vector<1x8xi32>
    %455 = arith.sitofp %454 : vector<1x8xi32> to vector<1x8xf32>
    %456 = arith.subf %455, %451 : vector<1x8xf32>
    %457 = vector.broadcast %450 : vector<1x1xf32> to vector<1x8xf32>
    %458 = arith.mulf %456, %457 : vector<1x8xf32>
    %c3_i32_155 = arith.constant 3 : i32
    %459 = vector.broadcast %c3_i32_155 : i32 to vector<8x1xi32>
    %460 = arith.cmpi eq, %0, %459 : vector<8x1xi32>
    %461 = vector.shape_cast %460 : vector<8x1xi1> to vector<8x1xi1>
    %462 = vector.broadcast %461 : vector<8x1xi1> to vector<8x8xi1>
    %463 = vector.shape_cast %458 : vector<1x8xf32> to vector<1x8xf32>
    %464 = vector.broadcast %463 : vector<1x8xf32> to vector<8x8xf32>
    %465 = arith.select %462, %464, %444 : vector<8x8xi1>, vector<8x8xf32>
    %466 = arith.mulf %458, %458 : vector<1x8xf32>
    %cst_156 = arith.constant dense<0.000000e+00> : vector<1xf32>
    %467 = vector.multi_reduction <add>, %466, %cst_156 [1] : vector<1x8xf32> to vector<1xf32>
    %468 = vector.shape_cast %467 : vector<1xf32> to vector<1x1xf32>
    %469 = arith.addf %448, %468 : vector<1x1xf32>
    %c2_157 = arith.constant 2 : index
    %c0_158 = arith.constant 0 : index
    %470 = vector.load %arg3[%c2_157, %c0_158] : memref<8x8xf32, #tpu.memory_space<vmem>>, vector<1x8xf32>
    %c2_159 = arith.constant 2 : index
    %c0_160 = arith.constant 0 : index
    %471 = vector.load %arg4[%c2_159, %c0_160] : memref<8x1xf32, #tpu.memory_space<vmem>>, vector<1x1xf32>
    %cst_161 = arith.constant dense<0.000000e+00> : vector<1x8xf32>
    %472 = tpu.matmul %470, %465, %cst_161 {dimension_numbers = #tpu.dot_dimension_numbers<[1], [0], [0], [1], [0, 0, 1, 1], [], []>} : vector<1x8xf32>, vector<8x8xf32>, vector<1x8xf32> -> vector<1x8xf32>
    %c2_i32_162 = arith.constant 2 : i32
    %473 = vector.broadcast %c2_i32_162 : i32 to vector<1x8xi32>
    %474 = arith.cmpi eq, %1, %473 : vector<1x8xi32>
    %475 = arith.extui %474 : vector<1x8xi1> to vector<1x8xi32>
    %476 = arith.sitofp %475 : vector<1x8xi32> to vector<1x8xf32>
    %477 = arith.subf %476, %472 : vector<1x8xf32>
    %478 = vector.broadcast %471 : vector<1x1xf32> to vector<1x8xf32>
    %479 = arith.mulf %477, %478 : vector<1x8xf32>
    %c2_i32_163 = arith.constant 2 : i32
    %480 = vector.broadcast %c2_i32_163 : i32 to vector<8x1xi32>
    %481 = arith.cmpi eq, %0, %480 : vector<8x1xi32>
    %482 = vector.shape_cast %481 : vector<8x1xi1> to vector<8x1xi1>
    %483 = vector.broadcast %482 : vector<8x1xi1> to vector<8x8xi1>
    %484 = vector.shape_cast %479 : vector<1x8xf32> to vector<1x8xf32>
    %485 = vector.broadcast %484 : vector<1x8xf32> to vector<8x8xf32>
    %486 = arith.select %483, %485, %465 : vector<8x8xi1>, vector<8x8xf32>
    %487 = arith.mulf %479, %479 : vector<1x8xf32>
    %cst_164 = arith.constant dense<0.000000e+00> : vector<1xf32>
    %488 = vector.multi_reduction <add>, %487, %cst_164 [1] : vector<1x8xf32> to vector<1xf32>
    %489 = vector.shape_cast %488 : vector<1xf32> to vector<1x1xf32>
    %490 = arith.addf %469, %489 : vector<1x1xf32>
    %c1_165 = arith.constant 1 : index
    %c0_166 = arith.constant 0 : index
    %491 = vector.load %arg3[%c1_165, %c0_166] : memref<8x8xf32, #tpu.memory_space<vmem>>, vector<1x8xf32>
    %c1_167 = arith.constant 1 : index
    %c0_168 = arith.constant 0 : index
    %492 = vector.load %arg4[%c1_167, %c0_168] : memref<8x1xf32, #tpu.memory_space<vmem>>, vector<1x1xf32>
    %cst_169 = arith.constant dense<0.000000e+00> : vector<1x8xf32>
    %493 = tpu.matmul %491, %486, %cst_169 {dimension_numbers = #tpu.dot_dimension_numbers<[1], [0], [0], [1], [0, 0, 1, 1], [], []>} : vector<1x8xf32>, vector<8x8xf32>, vector<1x8xf32> -> vector<1x8xf32>
    %c1_i32_170 = arith.constant 1 : i32
    %494 = vector.broadcast %c1_i32_170 : i32 to vector<1x8xi32>
    %495 = arith.cmpi eq, %1, %494 : vector<1x8xi32>
    %496 = arith.extui %495 : vector<1x8xi1> to vector<1x8xi32>
    %497 = arith.sitofp %496 : vector<1x8xi32> to vector<1x8xf32>
    %498 = arith.subf %497, %493 : vector<1x8xf32>
    %499 = vector.broadcast %492 : vector<1x1xf32> to vector<1x8xf32>
    %500 = arith.mulf %498, %499 : vector<1x8xf32>
    %c1_i32_171 = arith.constant 1 : i32
    %501 = vector.broadcast %c1_i32_171 : i32 to vector<8x1xi32>
    %502 = arith.cmpi eq, %0, %501 : vector<8x1xi32>
    %503 = vector.shape_cast %502 : vector<8x1xi1> to vector<8x1xi1>
    %504 = vector.broadcast %503 : vector<8x1xi1> to vector<8x8xi1>
    %505 = vector.shape_cast %500 : vector<1x8xf32> to vector<1x8xf32>
    %506 = vector.broadcast %505 : vector<1x8xf32> to vector<8x8xf32>
    %507 = arith.select %504, %506, %486 : vector<8x8xi1>, vector<8x8xf32>
    %508 = arith.mulf %500, %500 : vector<1x8xf32>
    %cst_172 = arith.constant dense<0.000000e+00> : vector<1xf32>
    %509 = vector.multi_reduction <add>, %508, %cst_172 [1] : vector<1x8xf32> to vector<1xf32>
    %510 = vector.shape_cast %509 : vector<1xf32> to vector<1x1xf32>
    %511 = arith.addf %490, %510 : vector<1x1xf32>
    %c0_173 = arith.constant 0 : index
    %c0_174 = arith.constant 0 : index
    %512 = vector.load %arg3[%c0_173, %c0_174] : memref<8x8xf32, #tpu.memory_space<vmem>>, vector<1x8xf32>
    %c0_175 = arith.constant 0 : index
    %c0_176 = arith.constant 0 : index
    %513 = vector.load %arg4[%c0_175, %c0_176] : memref<8x1xf32, #tpu.memory_space<vmem>>, vector<1x1xf32>
    %cst_177 = arith.constant dense<0.000000e+00> : vector<1x8xf32>
    %514 = tpu.matmul %512, %507, %cst_177 {dimension_numbers = #tpu.dot_dimension_numbers<[1], [0], [0], [1], [0, 0, 1, 1], [], []>} : vector<1x8xf32>, vector<8x8xf32>, vector<1x8xf32> -> vector<1x8xf32>
    %c0_i32_178 = arith.constant 0 : i32
    %515 = vector.broadcast %c0_i32_178 : i32 to vector<1x8xi32>
    %516 = arith.cmpi eq, %1, %515 : vector<1x8xi32>
    %517 = arith.extui %516 : vector<1x8xi1> to vector<1x8xi32>
    %518 = arith.sitofp %517 : vector<1x8xi32> to vector<1x8xf32>
    %519 = arith.subf %518, %514 : vector<1x8xf32>
    %520 = vector.broadcast %513 : vector<1x1xf32> to vector<1x8xf32>
    %521 = arith.mulf %519, %520 : vector<1x8xf32>
    %522 = arith.mulf %521, %521 : vector<1x8xf32>
    %cst_179 = arith.constant dense<0.000000e+00> : vector<1xf32>
    %523 = vector.multi_reduction <add>, %522, %cst_179 [1] : vector<1x8xf32> to vector<1xf32>
    %524 = vector.shape_cast %523 : vector<1xf32> to vector<1x1xf32>
    %525 = arith.addf %511, %524 : vector<1x1xf32>
    %c0_180 = arith.constant 0 : index
    %526 = memref.load %arg1[%c0_180] : memref<2xf32, #tpu.memory_space<smem>>
    %c1_181 = arith.constant 1 : index
    %527 = memref.load %arg1[%c1_181] : memref<2xf32, #tpu.memory_space<smem>>
    %cst_182 = arith.constant 2.000000e+00 : f32
    %528 = vector.broadcast %cst_182 : f32 to vector<1x1xf32>
    %529 = arith.mulf %528, %362 : vector<1x1xf32>
    %cst_183 = arith.constant 1.250000e-01 : f32
    %530 = vector.broadcast %cst_183 : f32 to vector<1x1xf32>
    %531 = arith.mulf %525, %530 : vector<1x1xf32>
    %cst_184 = arith.constant 8.500000e+00 : f32
    %532 = vector.broadcast %cst_184 : f32 to vector<1x1xf32>
    %533 = arith.mulf %532, %529 : vector<1x1xf32>
    %534 = vector.broadcast %527 : f32 to vector<1x1xf32>
    %535 = arith.subf %534, %533 : vector<1x1xf32>
    %cst_185 = arith.constant 5.000000e-01 : f32
    %536 = vector.broadcast %cst_185 : f32 to vector<1x1xf32>
    %537 = arith.mulf %536, %531 : vector<1x1xf32>
    %538 = arith.subf %535, %537 : vector<1x1xf32>
    %539 = vector.broadcast %526 : f32 to vector<1x1xf32>
    %540 = arith.mulf %539, %538 : vector<1x1xf32>
    %541 = arith.subf %360, %540 : vector<1x1xf32>
    %c0_186 = arith.constant 0 : index
    %c0_187 = arith.constant 0 : index
    %542 = vector.load %arg2[%c0_186, %c0_187] : memref<1x1xf32, #tpu.memory_space<vmem>>, vector<1x1xf32>
    tpu.vector_store %arg2[%c0_186, %c0_187], %541 {strides = array<i32>} : memref<1x1xf32, #tpu.memory_space<vmem>>, vector<1x1xf32>,
    return
  }
}

</mosaic_0001>

<bundles_post_ra>
// kernel: tpu_custom_call.1
= control target key start
LH: loop header
LB: loop body
LE: loop exit
PB: predicated region body
PF: predicated region fallthrough
CT: control target
= control target key end

     0   :  { %7 = vsyncpa [#allocation5], 0  ;;  %s1227_s0 = inlined_call_operand.hbm [shape: f32[8,8], index: 0, kind: input, shape index: {}]   ;;  %s1228_s1 = inlined_call_operand.hbm [shape: f32[2], index: 1, kind: input, shape index: {}]   ;;  %s1229_s2 = inlined_call_operand.hbm [shape: f32[1,1], index: 2, kind: output, shape index: {}]  }
   0x1   :  { %8 = vsyncpa [#allocation7], 0 }
   0x2   :  { %9 = vsyncpa [#allocation6], 0  ;;  %s15_s11 = sshll.u32 %s1227_s0, 4  ;;  %s1025_s12 = smov [#allocation4]   ;;  %s16_s11 = int_to_ptr.hbm [resolvable:$true] %s15_s11 }
   0x3   :  { %s17_s13 = sshll.u32 %s1025_s12, 4  ;;  %s26_s16 = sshll.u32 %s1228_s1, 4  ;;  %s18_s13 = int_to_ptr.vmem [resolvable:$true] %s17_s13  ;;  %s27_s16 = int_to_ptr.hbm [resolvable:$true] %s26_s16 }
   0x4   :  { %20 = dma.hbm_to_vmem [thread:$0]  %s16_s11, 128, %s18_s13, [#allocation5]  }
   0x5   :  { %s1026_s17 = smov [#allocation8]  }
   0x6   :  { %29 = dma.hbm_to_smem %s27_s16, 16, %s1026_s17, [#allocation7]  }
   0x7   :  { %1019 = dma.done.wait [#allocation5], 128  }
   0x8   :  { %1020 = vsyncadd [#allocation5], 4294967168 }
   0x9   :  { %1021 = dma.done.wait [#allocation7], 16  }
   0xa   :  { %1022 = vsyncadd [#allocation7], 4294967280 }
   0xb   :  { %38 = sfence }
   0xc   :  { %v39_v0 = vlaneseq  ;;  %v43_v2 = vld [vmem:[#allocation4] sm:$0xff]  ;;  %vm46_vm0 = vcmask 57344   ;;  %vm78_vm1 = vcmask 58369   ;;  %vm100_vm4 = vcmask 64512   ;;  %s918_s0 = sld [smem:[#allocation8 + $0x1]]  ;;  %s1029_s18 = smov [#allocation9]  }
   0xd   :  { %vm1230_vm6 = vcmask 0   ;;  %vm140_vm10 = vcmask 59394   ;;  %v1027_v30 = vmov 0   ;;  %vm120_vm12 = vcmask 1025   ;;  %s870_s1 = sld [smem:[#allocation8]]  ;;  %s888_s19 = sshll.u32 %s1029_s18, 4  ;;  %s889_s19 = int_to_ptr.vmem [resolvable:$true] %s888_s19 }
   0xe   :  { %v1052_v1 = vand.u32 127, %v39_v0  ;;  %924 = vset.pattern.permute.xlu2 %v1027_v30  ;;  %925 = vset.pattern.permute.xlu0 %v1027_v30  ;;  %v1080_v42 = vshrl.u32 %v39_v0, 7  ;;  %s890_s22 = sshll.u32 %s1229_s2, 4  ;;  %s891_s22 = int_to_ptr.hbm [resolvable:$true] %s890_s22 }
   0xf   :  { %926 = vset.pattern.permute.xlu1 %v1027_v30 }
  0x10   :  { %vm44_vm2 = vcmp.eq.s32.totalorder %v1052_v1, 0  ;;  %vm72_vm3 = vcmp.eq.s32.totalorder %v1052_v1, 1  ;;  %vm134_vm9 = vcmp.eq.s32.totalorder %v1052_v1, 2  ;;  %vm165_vm15 = vcmp.ge.s32.totalorder %v1080_v42, 1 }
  0x11   :  { %v45_v3 = vsel %vm44_vm2, %v43_v2, 0.0  ;;  %v77_v4 = vsel %vm72_vm3, %v43_v2, 0.0 }
  0x12   :  { %v47_v5 = vsel %vm46_vm0, %v45_v3, 0.0  ;;  %v79_v6 = vsel %vm78_vm1, %v77_v4, 0.0  ;;  %v101_v7 = vsel %vm100_vm4, %v45_v3, 0.0 }
  0x13   :  { %48 = vadd.xlane.f32.xlu0 %v47_v5  ;;  %80 = vadd.xlane.f32.xlu1 %v79_v6 }
  0x1b   :  { %102 = vadd.xlane.f32.xlu1 %v101_v7 }
  0x86   :  { %v49_v8 = vpop.xlane.xlu0 %48  ;;  %v81_v11 = vpop.xlane.xlu1 %80 }
  0x87   :  { %927 = vrsqrt.f32 %v49_v8  ;;  %vm56_vm7 = vweird.f32 %v49_v8 }
  0x8d   :  { %v928_v9 = vpop.eup %927 }
  0x8e   :  { %v51_v10 = vmul.f32 %v928_v9, %v49_v8  ;;  %vm57_vm5 = vweird.f32 %v928_v9  ;;  %v103_v17 = vpop.xlane.xlu1 %102 }
  0x8f   :  { %vm58_vm8 = vmor %vm56_vm7, %vm57_vm5  ;;  %vm111_vm5 = vcmp.ge.s32.totalorder %v1052_v1, 1  ;;  %vm200_vm7 = vcmp.eq.s32.totalorder %v1052_v1, 3 }
  0x90   :  { %v52_v12 = vmul.f32 %v928_v9, %v51_v10 }
  0x92   :  { %v53_v13 = vmul.f32 0.5, %v52_v12 }
  0x94   :  { %v54_v14 = vsub.f32 1.5, %v53_v13 }
  0x96   :  { %v55_v15 = vmul.f32 %v928_v9, %v54_v14 }
  0x98   :  { %v59_v16 = vsel %vm58_vm8, %v928_v9, %v55_v15  ;;  %vm206_vm8 = vcmask 60419  }
  0x99   :  { %65 = vst.msk [vmem:[#allocation3] sm:$0x1] %vm1230_vm6, %v59_v16  ;;  %v61_v18 = vmul.f32 %v59_v16, %v43_v2  ;;  %v105_v19 = vperm.slane %v59_v16, 0  ;;  %v66_v40 = vmul.f32 %v59_v16, %v49_v8 }
  0x9b   :  { %63 = vst.msk [vmem:[#allocation2] sm:$0x1] %vm46_vm0, %v61_v18  ;;  %v106_v20 = vmul.f32 %v105_v19, %v103_v17  ;;  %v108_v21 = vperm.slane %v61_v18, 0  ;;  %v73_v22 = vsel %vm72_vm3, %v61_v18, 0.0  ;;  %v67_v49 = vand.u32 2147483647, %v66_v40 }
  0x9c   :  { %v74_v24 = vsel %vm46_vm0, %v73_v22, 0.0 }
  0x9d   :  { %v109_v23 = vmul.f32 %v108_v21, %v106_v20  ;;  %75 = vadd.xlane.f32.xlu0 %v74_v24 }
  0x9f   :  { %v1068_v25 = vsub.f32 %v43_v2, %v109_v23 }
  0xa1   :  { %v161_v26 = vsel %vm72_vm3, %v1068_v25, 0.0  ;;  %v139_v28 = vsel %vm134_vm9, %v1068_v25, 0.0 }
  0xa2   :  { %v162_v27 = vsel %vm100_vm4, %v161_v26, 0.0  ;;  %v141_v29 = vsel %vm140_vm10, %v139_v28, 0.0 }
  0xa3   :  { %163 = vadd.xlane.f32.xlu1 %v162_v27 }
  0xa5   :  { %142 = vadd.xlane.f32.xlu0 %v141_v29 }
 0x110   :  { %v76_v31 = vpop.xlane.xlu0 %75 }
 0x111   :  { %v82_v32 = vmul.f32 %v76_v31, %v76_v31 }
 0x113   :  { %v84_v33 = vrot.slane %v82_v32, 7 }
 0x115   :  { %v86_v34 = vsub.f32 %v81_v11, %v84_v33 }
 0x116   :  { %v164_v46 = vpop.xlane.xlu1 %163 }
 0x117   :  { %929 = vrsqrt.f32 %v86_v34  ;;  %vm93_vm13 = vweird.f32 %v86_v34 }
 0x118   :  { %931 = vlog2.f32 %v66_v40  ;;  %v143_v0 = vpop.xlane.xlu0 %142 }
 0x11d   :  { %v930_v35 = vpop.eup %929 }
 0x11e   :  { %v88_v36 = vmul.f32 %v930_v35, %v86_v34  ;;  %vm94_vm11 = vweird.f32 %v930_v35  ;;  %v932_v53 = vpop.eup %931 }
 0x11f   :  { %vm95_vm14 = vmor %vm93_vm13, %vm94_vm11  ;;  %v70_v56 = vmul.f32 0.6931472, %v932_v53 }
 0x120   :  { %v89_v37 = vmul.f32 %v930_v35, %v88_v36 }
 0x122   :  { %v90_v38 = vmul.f32 0.5, %v89_v37 }
 0x124   :  { %v91_v39 = vsub.f32 1.5, %v90_v38 }
 0x126   :  { %v92_v41 = vmul.f32 %v930_v35, %v91_v39 }
 0x128   :  { %v96_v43 = vsel %vm95_vm14, %v930_v35, %v92_v41  ;;  %vm231_vm14 = vcmp.ge.s32.totalorder %v1080_v42, 2 }
 0x129   :  { %121 = vst.msk [vmem:[#allocation3] sm:$0x2] %vm120_vm12, %v96_v43  ;;  %v122_v44 = vmul.f32 %v96_v43, %v86_v34  ;;  %v166_v45 = vperm.slane %v96_v43, 1  ;;  %114 = vperm.xlu2 %924, %v96_v43   ;;  %vm186_vm12 = vcmask 2050  }
 0x12b   :  { %v123_v47 = vand.u32 2147483647, %v122_v44  ;;  %933 = vlog2.f32 %v122_v44  ;;  %v167_v48 = vmul.f32 %v166_v45, %v164_v46 }
 0x12d   :  { %v125_v50 = vrot.slane %v123_v47, 1  ;;  %v168_v51 = vsel %vm165_vm15, %v167_v48, 0.0  ;;  %vm177_vm15 = vcmp.ge.s32.totalorder %v1052_v1, 2 }
 0x12e   :  { %171 = vperm.xlu0 %925, %v168_v51  }
 0x12f   :  { %v127_v52 = vadd.f32 %v125_v50, %v67_v49 }
 0x131   :  { %v934_v54 = vpop.eup %933 }
 0x132   :  { %v129_v55 = vmul.f32 0.6931472, %v934_v54 }
 0x134   :  { %v131_v57 = vrot.slane %v129_v55, 1 }
 0x136   :  { %v133_v58 = vadd.f32 %v131_v57, %v70_v56 }
 0x183   :  { %v115_v59 = vpop.permute.xlu2 %114 }
 0x184   :  { %v117_v60 = vmul.f32 %v115_v59, %v1068_v25 }
 0x186   :  { %v118_v61 = vsel %vm111_vm5, %v117_v60, 0.0 }
 0x187   :  { %119 = vst.msk [vmem:[#allocation2] sm:$0x2] %vm78_vm1, %v118_v61  ;;  %v135_v62 = vsel %vm134_vm9, %v118_v61, 0.0  ;;  %v174_v2 = vperm.slane %v118_v61, 1 }
 0x188   :  { %v136_v63 = vsel %vm78_vm1, %v135_v62, 0.0 }
 0x189   :  { %137 = vadd.xlane.f32.xlu2 %v136_v63 }
 0x1a0   :  { %v172_v3 = vpop.permute.xlu0 %171 }
 0x1a1   :  { %v175_v4 = vmul.f32 %v174_v2, %v172_v3 }
 0x1a3   :  { %v176_v5 = vsub.f32 %v1068_v25, %v175_v4 }
 0x1a5   :  { %v205_v6 = vsel %vm200_vm7, %v176_v5, 0.0  ;;  %v227_v8 = vsel %vm134_vm9, %v176_v5, 0.0 }
 0x1a6   :  { %v207_v7 = vsel %vm206_vm8, %v205_v6, 0.0  ;;  %v228_v9 = vsel %vm100_vm4, %v227_v8, 0.0 }
 0x1a7   :  { %208 = vadd.xlane.f32.xlu2 %v207_v7 }
 0x1af   :  { %229 = vadd.xlane.f32.xlu2 %v228_v9 }
 0x1fc   :  { %v138_v10 = vpop.xlane.xlu2 %137 }
 0x1fd   :  { %v144_v11 = vmul.f32 %v138_v10, %v138_v10 }
 0x1ff   :  { %v146_v12 = vrot.slane %v144_v11, 7 }
 0x201   :  { %v148_v13 = vsub.f32 %v143_v0, %v146_v12 }
 0x203   :  { %935 = vrsqrt.f32 %v148_v13  ;;  %vm155_vm11 = vweird.f32 %v148_v13 }
 0x209   :  { %v936_v14 = vpop.eup %935 }
 0x20a   :  { %v150_v15 = vmul.f32 %v936_v14, %v148_v13  ;;  %vm156_vm1 = vweird.f32 %v936_v14 }
 0x20b   :  { %vm157_vm13 = vmor %vm155_vm11, %vm156_vm1  ;;  %vm252_vm1 = vcmask 3075  }
 0x20c   :  { %v151_v16 = vmul.f32 %v936_v14, %v150_v15 }
 0x20e   :  { %v152_v17 = vmul.f32 0.5, %v151_v16 }
 0x210   :  { %v153_v18 = vsub.f32 1.5, %v152_v17 }
 0x212   :  { %v154_v19 = vmul.f32 %v936_v14, %v153_v18 }
 0x214   :  { %v158_v20 = vsel %vm157_vm13, %v936_v14, %v154_v19  ;;  %vm266_vm13 = vcmp.eq.s32.totalorder %v1052_v1, 4 }
 0x215   :  { %180 = vperm.xlu1 %926, %v158_v20   ;;  %187 = vst.msk [vmem:[#allocation3] sm:$0x4] %vm186_vm12, %v158_v20  ;;  %v188_v21 = vmul.f32 %v158_v20, %v148_v13  ;;  %v232_v29 = vperm.slane %v158_v20, 2  ;;  %vm297_vm12 = vcmp.ge.s32.totalorder %v1080_v42, 3 }
 0x217   :  { %v189_v22 = vand.u32 2147483647, %v188_v21  ;;  %937 = vlog2.f32 %v188_v21 }
 0x219   :  { %v191_v23 = vrot.slane %v189_v22, 2 }
 0x21a   :  { %v209_v24 = vpop.xlane.xlu2 %208 }
 0x21b   :  { %v193_v25 = vadd.f32 %v191_v23, %v127_v52 }
 0x21d   :  { %v938_v26 = vpop.eup %937 }
 0x21e   :  { %v195_v27 = vmul.f32 0.6931472, %v938_v26 }
 0x220   :  { %v197_v28 = vrot.slane %v195_v27, 2 }
 0x222   :  { %v199_v30 = vadd.f32 %v197_v28, %v133_v58  ;;  %v230_v31 = vpop.xlane.xlu2 %229 }
 0x223   :  { %v233_v32 = vmul.f32 %v232_v29, %v230_v31 }
 0x225   :  { %v234_v33 = vsel %vm231_vm14, %v233_v32, 0.0  ;;  %vm272_vm14 = vcmask 61444  }
 0x226   :  { %237 = vperm.xlu0 %925, %v234_v33  }
 0x287   :  { %v181_v34 = vpop.permute.xlu1 %180 }
 0x288   :  { %v183_v35 = vmul.f32 %v181_v34, %v176_v5 }
 0x28a   :  { %v184_v36 = vsel %vm177_vm15, %v183_v35, 0.0  ;;  %vm243_vm15 = vcmp.ge.s32.totalorder %v1052_v1, 3 }
 0x28b   :  { %185 = vst.msk [vmem:[#allocation2] sm:$0x4] %vm140_vm10, %v184_v36  ;;  %v201_v37 = vsel %vm200_vm7, %v184_v36, 0.0  ;;  %v240_v39 = vperm.slane %v184_v36, 2 }
 0x28c   :  { %v202_v38 = vsel %vm140_vm10, %v201_v37, 0.0 }
 0x28d   :  { %203 = vadd.xlane.f32.xlu1 %v202_v38 }
 0x298   :  { %v238_v40 = vpop.permute.xlu0 %237 }
 0x299   :  { %v241_v41 = vmul.f32 %v240_v39, %v238_v40 }
 0x29b   :  { %v242_v43 = vsub.f32 %v176_v5, %v241_v41 }
 0x29d   :  { %v293_v44 = vsel %vm200_vm7, %v242_v43, 0.0  ;;  %v271_v6 = vsel %vm266_vm13, %v242_v43, 0.0 }
 0x29e   :  { %v294_v45 = vsel %vm100_vm4, %v293_v44, 0.0  ;;  %v273_v7 = vsel %vm272_vm14, %v271_v6, 0.0 }
 0x29f   :  { %295 = vadd.xlane.f32.xlu1 %v294_v45 }
 0x300   :  { %v204_v46 = vpop.xlane.xlu1 %203 }
 0x301   :  { %v210_v47 = vmul.f32 %v204_v46, %v204_v46 }
 0x303   :  { %v212_v48 = vrot.slane %v210_v47, 7 }
 0x305   :  { %v214_v49 = vsub.f32 %v209_v24, %v212_v48 }
 0x307   :  { %939 = vrsqrt.f32 %v214_v49  ;;  %vm221_vm5 = vweird.f32 %v214_v49 }
 0x30d   :  { %v940_v50 = vpop.eup %939 }
 0x30e   :  { %v216_v51 = vmul.f32 %v940_v50, %v214_v49  ;;  %vm222_vm10 = vweird.f32 %v940_v50 }
 0x30f   :  { %vm223_vm11 = vmor %vm221_vm5, %vm222_vm10  ;;  %vm332_vm10 = vcmp.eq.s32.totalorder %v1052_v1, 5  ;;  %vm338_vm5 = vcmask 62469  }
 0x310   :  { %v217_v52 = vmul.f32 %v940_v50, %v216_v51 }
 0x312   :  { %v218_v53 = vmul.f32 0.5, %v217_v52  ;;  %v296_v59 = vpop.xlane.xlu1 %295 }
 0x314   :  { %v219_v54 = vsub.f32 1.5, %v218_v53 }
 0x316   :  { %v220_v55 = vmul.f32 %v940_v50, %v219_v54 }
 0x318   :  { %v224_v56 = vsel %vm223_vm11, %v940_v50, %v220_v55  ;;  %vm318_vm11 = vcmask 4100  }
 0x319   :  { %253 = vst.msk [vmem:[#allocation3] sm:$0x8] %vm252_vm1, %v224_v56  ;;  %v254_v57 = vmul.f32 %v224_v56, %v214_v49  ;;  %v298_v58 = vperm.slane %v224_v56, 3  ;;  %246 = vperm.xlu2 %924, %v224_v56  }
 0x31b   :  { %v255_v60 = vand.u32 2147483647, %v254_v57  ;;  %941 = vlog2.f32 %v254_v57  ;;  %v299_v61 = vmul.f32 %v298_v58, %v296_v59 }
 0x31d   :  { %v257_v62 = vrot.slane %v255_v60, 3  ;;  %v300_v63 = vsel %vm297_vm12, %v299_v61, 0.0 }
 0x31e   :  { %303 = vperm.xlu1 %926, %v300_v63  }
 0x31f   :  { %v259_v0 = vadd.f32 %v257_v62, %v193_v25 }
 0x321   :  { %v942_v2 = vpop.eup %941 }
 0x322   :  { %v261_v3 = vmul.f32 0.6931472, %v942_v2 }
 0x324   :  { %v263_v4 = vrot.slane %v261_v3, 3 }
 0x326   :  { %v265_v5 = vadd.f32 %v263_v4, %v199_v30 }
 0x342   :  { %274 = vadd.xlane.f32.xlu2 %v273_v7 }
 0x373   :  { %v247_v8 = vpop.permute.xlu2 %246 }
 0x374   :  { %v249_v9 = vmul.f32 %v247_v8, %v242_v43 }
 0x376   :  { %v250_v10 = vsel %vm243_vm15, %v249_v9, 0.0  ;;  %vm309_vm15 = vcmp.ge.s32.totalorder %v1052_v1, 4 }
 0x377   :  { %251 = vst.msk [vmem:[#allocation2] sm:$0x8] %vm206_vm8, %v250_v10  ;;  %v267_v11 = vsel %vm266_vm13, %v250_v10, 0.0  ;;  %v306_v13 = vperm.slane %v250_v10, 3 }
 0x378   :  { %v268_v12 = vsel %vm206_vm8, %v267_v11, 0.0 }
 0x379   :  { %269 = vadd.xlane.f32.xlu0 %v268_v12 }
 0x390   :  { %v304_v14 = vpop.permute.xlu1 %303 }
 0x391   :  { %v307_v15 = vmul.f32 %v306_v13, %v304_v14 }
 0x393   :  { %v1117_v16 = vsub.f32 %v242_v43, %v307_v15 }
 0x395   :  { %v337_v17 = vsel %vm332_vm10, %v1117_v16, 0.0  ;;  %v359_v39 = vsel %vm266_vm13, %v1117_v16, 0.0 }
 0x396   :  { %v339_v18 = vsel %vm338_vm5, %v337_v17, 0.0  ;;  %v360_v40 = vsel %vm100_vm4, %v359_v39, 0.0 }
 0x397   :  { %340 = vadd.xlane.f32.xlu2 %v339_v18 }
 0x3b5   :  { %v275_v22 = vpop.xlane.xlu2 %274 }
 0x3ec   :  { %v270_v19 = vpop.xlane.xlu0 %269 }
 0x3ed   :  { %v276_v20 = vmul.f32 %v270_v19, %v270_v19 }
 0x3ef   :  { %v278_v21 = vrot.slane %v276_v20, 7 }
 0x3f1   :  { %v280_v23 = vsub.f32 %v275_v22, %v278_v21 }
 0x3f3   :  { %943 = vrsqrt.f32 %v280_v23  ;;  %vm287_vm1 = vweird.f32 %v280_v23 }
 0x3f9   :  { %v944_v24 = vpop.eup %943 }
 0x3fa   :  { %v282_v25 = vmul.f32 %v944_v24, %v280_v23  ;;  %vm288_vm8 = vweird.f32 %v944_v24 }
 0x3fb   :  { %vm289_vm12 = vmor %vm287_vm1, %vm288_vm8  ;;  %vm363_vm8 = vcmp.ge.s32.totalorder %v1080_v42, 4 }
 0x3fc   :  { %v283_v26 = vmul.f32 %v944_v24, %v282_v25 }
 0x3fe   :  { %v284_v27 = vmul.f32 0.5, %v283_v26 }
 0x400   :  { %v285_v28 = vsub.f32 1.5, %v284_v27 }
 0x402   :  { %v286_v29 = vmul.f32 %v944_v24, %v285_v28 }
 0x404   :  { %v290_v30 = vsel %vm289_vm12, %v944_v24, %v286_v29 }
 0x405   :  { %312 = vperm.xlu0 %925, %v290_v30   ;;  %319 = vst.msk [vmem:[#allocation3] sm:$0x10] %vm318_vm11, %v290_v30  ;;  %v320_v31 = vmul.f32 %v290_v30, %v280_v23  ;;  %v364_v47 = vperm.slane %v290_v30, 4  ;;  %vm384_vm11 = vcmask 5125  }
 0x407   :  { %v321_v32 = vand.u32 2147483647, %v320_v31  ;;  %945 = vlog2.f32 %v320_v31 }
 0x409   :  { %v323_v33 = vrot.slane %v321_v32, 4 }
 0x40a   :  { %v341_v54 = vpop.xlane.xlu2 %340 }
 0x40b   :  { %v325_v34 = vadd.f32 %v323_v33, %v259_v0 }
 0x40d   :  { %v946_v35 = vpop.eup %945 }
 0x40e   :  { %v327_v36 = vmul.f32 0.6931472, %v946_v35 }
 0x410   :  { %v329_v37 = vrot.slane %v327_v36, 4 }
 0x412   :  { %v331_v38 = vadd.f32 %v329_v37, %v265_v5 }
 0x42f   :  { %361 = vadd.xlane.f32.xlu0 %v360_v40 }
 0x477   :  { %v313_v41 = vpop.permute.xlu0 %312 }
 0x478   :  { %v315_v43 = vmul.f32 %v313_v41, %v1117_v16 }
 0x47a   :  { %v316_v44 = vsel %vm309_vm15, %v315_v43, 0.0  ;;  %vm398_vm15 = vcmp.eq.s32.totalorder %v1052_v1, 6 }
 0x47b   :  { %317 = vst.msk [vmem:[#allocation2] sm:$0x10] %vm272_vm14, %v316_v44  ;;  %v333_v45 = vsel %vm332_vm10, %v316_v44, 0.0  ;;  %v372_v9 = vperm.slane %v316_v44, 4 }
 0x47c   :  { %v334_v46 = vsel %vm272_vm14, %v333_v45, 0.0 }
 0x47d   :  { %335 = vadd.xlane.f32.xlu1 %v334_v46 }
 0x4a2   :  { %v362_v48 = vpop.xlane.xlu0 %361 }
 0x4a3   :  { %v365_v49 = vmul.f32 %v364_v47, %v362_v48 }
 0x4a5   :  { %v366_v50 = vsel %vm363_vm8, %v365_v49, 0.0  ;;  %vm404_vm8 = vcmask 63494  }
 0x4a6   :  { %369 = vperm.xlu2 %924, %v366_v50  }
 0x4f0   :  { %v336_v51 = vpop.xlane.xlu1 %335 }
 0x4f1   :  { %v342_v52 = vmul.f32 %v336_v51, %v336_v51 }
 0x4f3   :  { %v344_v53 = vrot.slane %v342_v52, 7 }
 0x4f5   :  { %v346_v55 = vsub.f32 %v341_v54, %v344_v53 }
 0x4f7   :  { %947 = vrsqrt.f32 %v346_v55  ;;  %vm353_vm1 = vweird.f32 %v346_v55 }
 0x4fd   :  { %v948_v56 = vpop.eup %947 }
 0x4fe   :  { %v348_v57 = vmul.f32 %v948_v56, %v346_v55  ;;  %vm354_vm14 = vweird.f32 %v948_v56 }
 0x4ff   :  { %vm355_vm12 = vmor %vm353_vm1, %vm354_vm14  ;;  %vm375_vm14 = vcmp.ge.s32.totalorder %v1052_v1, 5  ;;  %vm429_vm1 = vcmp.ge.s32.totalorder %v1080_v42, 5 }
 0x500   :  { %v349_v58 = vmul.f32 %v948_v56, %v348_v57  ;;  %v370_v8 = vpop.permute.xlu2 %369 }
 0x501   :  { %v373_v10 = vmul.f32 %v372_v9, %v370_v8 }
 0x502   :  { %v350_v59 = vmul.f32 0.5, %v349_v58 }
 0x503   :  { %v374_v11 = vsub.f32 %v1117_v16, %v373_v10 }
 0x504   :  { %v351_v60 = vsub.f32 1.5, %v350_v59 }
 0x505   :  { %v403_v12 = vsel %vm398_vm15, %v374_v11, 0.0  ;;  %v425_v19 = vsel %vm332_vm10, %v374_v11, 0.0 }
 0x506   :  { %v352_v61 = vmul.f32 %v948_v56, %v351_v60  ;;  %v405_v13 = vsel %vm404_vm8, %v403_v12, 0.0  ;;  %v426_v20 = vsel %vm100_vm4, %v425_v19, 0.0 }
 0x508   :  { %v356_v62 = vsel %vm355_vm12, %v948_v56, %v352_v61  ;;  %vm450_vm12 = vcmask 6150  }
 0x509   :  { %378 = vperm.xlu2 %924, %v356_v62   ;;  %385 = vst.msk [vmem:[#allocation3] sm:$0x20] %vm384_vm11, %v356_v62  ;;  %v386_v63 = vmul.f32 %v356_v62, %v346_v55  ;;  %v430_v26 = vperm.slane %v356_v62, 5 }
 0x50b   :  { %v387_v0 = vand.u32 2147483647, %v386_v63  ;;  %949 = vlog2.f32 %v386_v63 }
 0x50d   :  { %v389_v2 = vrot.slane %v387_v0, 5 }
 0x50f   :  { %v391_v3 = vadd.f32 %v389_v2, %v325_v34 }
 0x511   :  { %v950_v4 = vpop.eup %949 }
 0x512   :  { %v393_v5 = vmul.f32 0.6931472, %v950_v4 }
 0x514   :  { %v395_v6 = vrot.slane %v393_v5, 5 }
 0x516   :  { %v397_v7 = vadd.f32 %v395_v6, %v331_v38 }
 0x532   :  { %406 = vadd.xlane.f32.xlu2 %v405_v13 }
 0x563   :  { %v379_v14 = vpop.permute.xlu2 %378 }
 0x564   :  { %v381_v15 = vmul.f32 %v379_v14, %v374_v11 }
 0x566   :  { %v382_v17 = vsel %vm375_vm14, %v381_v15, 0.0 }
 0x567   :  { %383 = vst.msk [vmem:[#allocation2] sm:$0x20] %vm338_vm5, %v382_v17  ;;  %v399_v18 = vsel %vm398_vm15, %v382_v17, 0.0  ;;  %v438_v46 = vperm.slane %v382_v17, 5 }
 0x568   :  { %v400_v16 = vsel %vm338_vm5, %v399_v18, 0.0  ;;  %v661_v18 = vld [vmem:[#allocation3 + $0x4] sm:$0x1] }
 0x569   :  { %401 = vadd.xlane.f32.xlu1 %v400_v16 }
 0x571   :  { %427 = vadd.xlane.f32.xlu1 %v426_v20 }
 0x5a5   :  { %v407_v24 = vpop.xlane.xlu2 %406 }
 0x5dc   :  { %v402_v21 = vpop.xlane.xlu1 %401 }
 0x5dd   :  { %v408_v22 = vmul.f32 %v402_v21, %v402_v21 }
 0x5df   :  { %v410_v23 = vrot.slane %v408_v22, 7 }
 0x5e1   :  { %v412_v25 = vsub.f32 %v407_v24, %v410_v23  ;;  %v747_v23 = vld [vmem:[#allocation3 + $0x2] sm:$0x1]  ;;  %v618_v24 = vld [vmem:[#allocation3 + $0x5] sm:$0x1] }
 0x5e3   :  { %951 = vrsqrt.f32 %v412_v25  ;;  %vm419_vm11 = vweird.f32 %v412_v25 }
 0x5e4   :  { %v428_v27 = vpop.xlane.xlu1 %427 }
 0x5e5   :  { %v431_v28 = vmul.f32 %v430_v26, %v428_v27  ;;  %v790_v26 = vld [vmem:[#allocation3 + $0x1] sm:$0x1]  ;;  %v1028_v27 = vmov 0.0  }
 0x5e6   :  { %550 = vmatpush.msra.mxu0 %v1028_v27 }
 0x5e7   :  { %v432_v29 = vsel %vm429_vm1, %v431_v28, 0.0  ;;  %vm464_vm1 = vcmp.eq.s32.totalorder %v1052_v1, 7 }
 0x5e8   :  { %435 = vperm.xlu0 %925, %v432_v29  }
 0x5e9   :  { %v952_v30 = vpop.eup %951 }
 0x5ea   :  { %v414_v31 = vmul.f32 %v952_v30, %v412_v25  ;;  %vm420_vm5 = vweird.f32 %v952_v30 }
 0x5eb   :  { %vm421_vm14 = vmor %vm419_vm11, %vm420_vm5  ;;  %vm470_vm5 = vcmask 64519   ;;  %vm441_vm11 = vcmp.ge.s32.totalorder %v1052_v1, 6 }
 0x5ec   :  { %v415_v32 = vmul.f32 %v952_v30, %v414_v31 }
 0x5ee   :  { %v416_v33 = vmul.f32 0.5, %v415_v32 }
 0x5f0   :  { %v417_v34 = vsub.f32 1.5, %v416_v33 }
 0x5f2   :  { %v418_v35 = vmul.f32 %v952_v30, %v417_v34 }
 0x5f4   :  { %v422_v36 = vsel %vm421_vm14, %v952_v30, %v418_v35 }
 0x5f5   :  { %444 = vperm.xlu1 %926, %v422_v36   ;;  %451 = vst.msk [vmem:[#allocation3] sm:$0x40] %vm450_vm12, %v422_v36  ;;  %v452_v37 = vmul.f32 %v422_v36, %v412_v25  ;;  %v496_v60 = vperm.slane %v422_v36, 6  ;;  %vm495_vm12 = vcmp.ge.s32.totalorder %v1080_v42, 6  ;;  %v704_v25 = vld [vmem:[#allocation3 + $0x3] sm:$0x1] }
 0x5f6   :  { %v902_v36 = vsel %vm464_vm1, 1.0, %v1028_v27 }
 0x5f7   :  { %v453_v38 = vand.u32 2147483647, %v452_v37  ;;  %953 = vlog2.f32 %v452_v37 }
 0x5f9   :  { %v455_v39 = vrot.slane %v453_v38, 6 }
 0x5fb   :  { %v457_v40 = vadd.f32 %v455_v39, %v391_v3 }
 0x5fc   :  { %v575_v59 = vld [vmem:[#allocation3 + $0x6] sm:$0x1] }
 0x5fd   :  { %v954_v41 = vpop.eup %953 }
 0x5fe   :  { %v459_v43 = vmul.f32 0.6931472, %v954_v41 }
 0x600   :  { %v461_v44 = vrot.slane %v459_v43, 6 }
 0x602   :  { %v463_v45 = vadd.f32 %v461_v44, %v397_v7 }
 0x65a   :  { %v436_v47 = vpop.permute.xlu0 %435 }
 0x65b   :  { %v439_v48 = vmul.f32 %v438_v46, %v436_v47  ;;  %v905_v47 = vsel %vm398_vm15, 1.0, %v1028_v27 }
 0x65d   :  { %v1149_v49 = vsub.f32 %v374_v11, %v439_v48 }
 0x65f   :  { %v491_v50 = vsel %vm398_vm15, %v1149_v49, 0.0  ;;  %v469_v51 = vsel %vm464_vm1, %v1149_v49, 0.0  ;;  %vm650_vm15 = vcmp.eq.s32.totalorder %v1080_v42, 5 }
 0x660   :  { %v492_v52 = vsel %vm100_vm4, %v491_v50, 0.0  ;;  %v471_v53 = vsel %vm470_vm5, %v469_v51, 0.0 }
 0x661   :  { %493 = vadd.xlane.f32.xlu2 %v492_v52  ;;  %472 = vadd.xlane.f32.xlu1 %v471_v53 }
 0x667   :  { %v445_v54 = vpop.permute.xlu1 %444 }
 0x668   :  { %v447_v55 = vmul.f32 %v445_v54, %v1149_v49 }
 0x66a   :  { %v448_v56 = vsel %vm441_vm11, %v447_v55, 0.0  ;;  %vm516_vm11 = vcmask 7175  }
 0x66b   :  { %449 = vst.msk [vmem:[#allocation2] sm:$0x40] %vm404_vm8, %v448_v56  ;;  %v465_v57 = vsel %vm464_vm1, %v448_v56, 0.0  ;;  %v504_v29 = vperm.slane %v448_v56, 6  ;;  %vm607_vm1 = vcmp.eq.s32.totalorder %v1080_v42, 6 }
 0x66c   :  { %v466_v58 = vsel %vm404_vm8, %v465_v57, 0.0  ;;  %v617_v56 = vld [vmem:[#allocation2 + $0x5] sm:$0x1]  ;;  %v907_v57 = vsel %vm332_vm10, 1.0, %v1028_v27  ;;  %vm693_vm10 = vcmp.eq.s32.totalorder %v1080_v42, 4 }
 0x66d   :  { %467 = vadd.xlane.f32.xlu0 %v466_v58 }
 0x672   :  { %v574_v46 = vld [vmem:[#allocation2 + $0x6] sm:$0x1] }
 0x67a   :  { %603 = vperm.xlu1 %926, %v575_v59  }
 0x6d4   :  { %v494_v61 = vpop.xlane.xlu2 %493  ;;  %v473_v4 = vpop.xlane.xlu1 %472 }
 0x6d5   :  { %v497_v62 = vmul.f32 %v496_v60, %v494_v61 }
 0x6d7   :  { %v498_v63 = vsel %vm495_vm12, %v497_v62, 0.0  ;;  %vm564_vm12 = vcmp.eq.s32.totalorder %v1080_v42, 7 }
 0x6d8   :  { %501 = vperm.xlu2 %924, %v498_v63  }
 0x6e0   :  { %v468_v0 = vpop.xlane.xlu0 %467 }
 0x6e1   :  { %v474_v2 = vmul.f32 %v468_v0, %v468_v0 }
 0x6e3   :  { %v476_v3 = vrot.slane %v474_v2, 7 }
 0x6e5   :  { %v478_v5 = vsub.f32 %v473_v4, %v476_v3  ;;  %v660_v3 = vld [vmem:[#allocation2 + $0x4] sm:$0x1]  ;;  %v909_v4 = vsel %vm266_vm13, 1.0, %v1028_v27  ;;  %vm736_vm13 = vcmp.eq.s32.totalorder %v1080_v42, 3 }
 0x6e7   :  { %955 = vrsqrt.f32 %v478_v5  ;;  %vm485_vm14 = vweird.f32 %v478_v5 }
 0x6ec   :  { %v604_v50 = vpop.permute.xlu1 %603 }
 0x6ed   :  { %v956_v6 = vpop.eup %955 }
 0x6ee   :  { %v480_v7 = vmul.f32 %v956_v6, %v478_v5  ;;  %vm486_vm8 = vweird.f32 %v956_v6 }
 0x6ef   :  { %vm487_vm6 = vmor %vm485_vm14, %vm486_vm8 }
 0x6f0   :  { %v481_v8 = vmul.f32 %v956_v6, %v480_v7 }
 0x6f2   :  { %v482_v9 = vmul.f32 0.5, %v481_v8 }
 0x6f4   :  { %v483_v10 = vsub.f32 1.5, %v482_v9 }
 0x6f6   :  { %v484_v11 = vmul.f32 %v956_v6, %v483_v10 }
 0x6f8   :  { %v488_v12 = vsel %vm487_vm6, %v956_v6, %v484_v11  ;;  %vm507_vm6 = vcmp.ge.s32.totalorder %v1052_v1, 7 }
 0x6f9   :  { %510 = vperm.xlu0 %925, %v488_v12   ;;  %517 = vst.msk [vmem:[#allocation3] sm:$0x80] %vm516_vm11, %v488_v12  ;;  %v518_v13 = vmul.f32 %v488_v12, %v478_v5 }
 0x6fb   :  { %v519_v14 = vand.u32 2147483647, %v518_v13  ;;  %957 = vlog2.f32 %v518_v13  ;;  %v703_v13 = vld [vmem:[#allocation2 + $0x3] sm:$0x1] }
 0x6fd   :  { %v521_v15 = vrot.slane %v519_v14, 7  ;;  %v911_v14 = vsel %vm200_vm7, 1.0, %v1028_v27  ;;  %vm779_vm7 = vcmp.eq.s32.totalorder %v1080_v42, 2 }
 0x6ff   :  { %v1166_v17 = vadd.f32 %v521_v15, %v457_v40 }
 0x700   :  { %v531_v16 = vld [vmem:[#allocation3 + $0x7] sm:$0x1] }
 0x701   :  { %v958_v19 = vpop.eup %957  ;;  %689 = vperm.xlu0 %925, %v661_v18   ;;  %560 = vperm.xlu2 %924, %v531_v16  }
 0x702   :  { %v525_v20 = vmul.f32 0.6931472, %v958_v19 }
 0x704   :  { %v527_v21 = vrot.slane %v525_v20, 7 }
 0x706   :  { %v1168_v22 = vadd.f32 %v527_v21, %v463_v45 }
 0x709   :  { %775 = vperm.xlu0 %925, %v747_v23   ;;  %646 = vperm.xlu2 %924, %v618_v24  }
 0x711   :  { %732 = vperm.xlu2 %924, %v704_v25   ;;  %v746_v25 = vld [vmem:[#allocation2 + $0x2] sm:$0x1] }
 0x719   :  { %818 = vperm.xlu2 %924, %v790_v26   ;;  %v833_v26 = vld [vmem:[#allocation3] sm:$0x1] }
 0x732   :  { %v502_v28 = vpop.permute.xlu2 %501 }
 0x733   :  { %v505_v30 = vmul.f32 %v504_v29, %v502_v28  ;;  %v913_v28 = vsel %vm134_vm9, 1.0, %v1028_v27  ;;  %vm822_vm9 = vcmp.eq.s32.totalorder %v1080_v42, 1 }
 0x735   :  { %v506_v31 = vsub.f32 %v1149_v49, %v505_v30 }
 0x75b   :  { %v561_v39 = vpop.permute.xlu2 %560 }
 0x763   :  { %v647_v60 = vpop.permute.xlu2 %646 }
 0x76b   :  { %v511_v32 = vpop.permute.xlu0 %510  ;;  %v733_v16 = vpop.permute.xlu2 %732 }
 0x76c   :  { %v513_v33 = vmul.f32 %v511_v32, %v506_v31 }
 0x76e   :  { %v514_v34 = vsel %vm507_vm6, %v513_v33, 0.0 }
 0x76f   :  { %515 = vst.msk [vmem:[#allocation2] sm:$0x80] %vm470_vm5, %v514_v34 }
 0x773   :  { %v690_v7 = vpop.permute.xlu0 %689 }
 0x776   :  { %v530_v35 = vld [vmem:[#allocation2 + $0x7] sm:$0x1] }
 0x777   :  { %901 = vmatmul.msk.f32.vlgmr.msra.gmra.mxu0 %vm100_vm4, %v530_v35 }
 0x77b   :  { %v776_v31 = vpop.permute.xlu0 %775 }
 0x7f4   :  { %v552_v37 = vpop.f32.mrf.mxu0 }
 0x7f5   :  { %v557_v38 = vsub.f32 %v902_v36, %v552_v37  ;;  %v789_v37 = vld [vmem:[#allocation2 + $0x1] sm:$0x1] }
 0x7f7   :  { %v563_v40 = vmul.f32 %v561_v39, %v557_v38  ;;  %v915_v38 = vsel %vm72_vm3, 1.0, %v1028_v27 }
 0x7f9   :  { %v567_v41 = vperm.slane %v563_v40, 0  ;;  %v569_v43 = vmul.f32 %v563_v40, %v563_v40 }
 0x7fb   :  { %v568_v44 = vsel %vm564_vm12, %v567_v41, 0.0  ;;  %903 = vmatpush.msk.msra.mxu1 %vm564_vm12, %v567_v41  ;;  %v570_v45 = vsel %vm46_vm0, %v569_v43, 0.0  ;;  %v819_v41 = vpop.permute.xlu2 %818 }
 0x7fc   :  { %571 = vadd.xlane.f32.xlu0 %v570_v45  ;;  %904 = vmatmul.msk.f32.vlgmr.msra.gmra.mxu1 %vm100_vm4, %v574_v46 }
 0x879   :  { %v596_v48 = vpop.f32.mrf.mxu1 }
 0x87a   :  { %v600_v49 = vsub.f32 %v905_v47, %v596_v48  ;;  %v832_v48 = vld [vmem:[#allocation2] sm:$0x1] }
 0x87c   :  { %v606_v51 = vmul.f32 %v604_v50, %v600_v49 }
 0x87e   :  { %v610_v52 = vperm.slane %v606_v51, 0  ;;  %v612_v53 = vmul.f32 %v606_v51, %v606_v51  ;;  %v917_v51 = vsel %vm44_vm2, 1.0, %v1028_v27  ;;  %v872_v27 = vmul.f32 2.0, %v1168_v22 }
 0x880   :  { %v613_v54 = vsel %vm46_vm0, %v612_v53, 0.0  ;;  %v611_v55 = vsel %vm607_vm1, %v610_v52, %v568_v44 }
 0x881   :  { %614 = vadd.xlane.f32.xlu1 %v613_v54  ;;  %637 = vmatpush.msra.mxu2 %v611_v55 }
 0x882   :  { %906 = vmatmul.msk.f32.vlgmr.msra.gmra.mxu2 %vm100_vm4, %v617_v56 }
 0x8f4   :  { %v615_v49 = vpop.xlane.xlu1 %614 }
 0x905   :  { %v639_v58 = vpop.f32.mrf.mxu2 }
 0x906   :  { %v643_v59 = vsub.f32 %v907_v57, %v639_v58  ;;  %v572_v57 = vpop.xlane.xlu0 %571 }
 0x908   :  { %v649_v61 = vmul.f32 %v647_v60, %v643_v59  ;;  %v616_v60 = vadd.f32 %v615_v49, %v572_v57 }
 0x90a   :  { %v653_v62 = vperm.slane %v649_v61, 0  ;;  %v655_v63 = vmul.f32 %v649_v61, %v649_v61 }
 0x90c   :  { %v656_v0 = vsel %vm46_vm0, %v655_v63, 0.0  ;;  %v654_v2 = vsel %vm650_vm15, %v653_v62, %v611_v55 }
 0x90d   :  { %657 = vadd.xlane.f32.xlu2 %v656_v0  ;;  %680 = vmatpush.msra.mxu3 %v654_v2 }
 0x90e   :  { %908 = vmatmul.msk.f32.vlgmr.msra.gmra.mxu3 %vm100_vm4, %v660_v3 }
 0x980   :  { %v658_v58 = vpop.xlane.xlu2 %657 }
 0x981   :  { %v659_v61 = vadd.f32 %v658_v58, %v616_v60 }
 0x991   :  { %v682_v5 = vpop.f32.mrf.mxu3 }
 0x992   :  { %v686_v6 = vsub.f32 %v909_v4, %v682_v5  ;;  %v874_v5 = vmul.f32 8.5, %v872_v27 }
 0x994   :  { %v692_v8 = vmul.f32 %v690_v7, %v686_v6  ;;  %v875_v7 = vstv %s918_s0 }
 0x996   :  { %v696_v9 = vperm.slane %v692_v8, 0  ;;  %v698_v10 = vmul.f32 %v692_v8, %v692_v8 }
 0x998   :  { %v699_v11 = vsel %vm46_vm0, %v698_v10, 0.0  ;;  %v697_v12 = vsel %vm693_vm10, %v696_v9, %v654_v2  ;;  %v876_v9 = vsub.f32 %v875_v7, %v874_v5 }
 0x999   :  { %700 = vadd.xlane.f32.xlu0 %v699_v11  ;;  %723 = vmatpush.msrb.mxu0 %v697_v12  ;;  %v879_v11 = vstv %s870_s1 }
 0x99a   :  { %910 = vmatmul.msk.f32.vlgmr.msrb.gmra.mxu0 %vm100_vm4, %v703_v13 }
 0xa0c   :  { %v701_v59 = vpop.xlane.xlu0 %700 }
 0xa0d   :  { %v702_v63 = vadd.f32 %v701_v59, %v659_v61 }
 0xa17   :  { %v725_v15 = vpop.f32.mrf.mxu0 }
 0xa18   :  { %v729_v18 = vsub.f32 %v911_v14, %v725_v15 }
 0xa1a   :  { %v735_v19 = vmul.f32 %v733_v16, %v729_v18 }
 0xa1c   :  { %v739_v20 = vperm.slane %v735_v19, 0  ;;  %v741_v21 = vmul.f32 %v735_v19, %v735_v19 }
 0xa1e   :  { %v742_v23 = vsel %vm46_vm0, %v741_v21, 0.0  ;;  %v740_v24 = vsel %vm736_vm13, %v739_v20, %v697_v12 }
 0xa1f   :  { %743 = vadd.xlane.f32.xlu1 %v742_v23  ;;  %766 = vmatpush.msrb.mxu1 %v740_v24 }
 0xa20   :  { %912 = vmatmul.msk.f32.vlgmr.msrb.gmra.mxu1 %vm100_vm4, %v746_v25 }
 0xa38   :  { %861 = vperm.xlu1 %926, %v833_v26  }
 0xa92   :  { %v744_v50 = vpop.xlane.xlu1 %743 }
 0xa93   :  { %v745_v0 = vadd.f32 %v744_v50, %v702_v63 }
 0xa9d   :  { %v768_v29 = vpop.f32.mrf.mxu1 }
 0xa9e   :  { %v772_v30 = vsub.f32 %v913_v28, %v768_v29 }
 0xaa0   :  { %v778_v32 = vmul.f32 %v776_v31, %v772_v30 }
 0xaa2   :  { %v782_v33 = vperm.slane %v778_v32, 0  ;;  %v784_v34 = vmul.f32 %v778_v32, %v778_v32 }
 0xaa4   :  { %v785_v35 = vsel %vm46_vm0, %v784_v34, 0.0  ;;  %v783_v36 = vsel %vm779_vm7, %v782_v33, %v740_v24 }
 0xaa5   :  { %786 = vadd.xlane.f32.xlu2 %v785_v35  ;;  %809 = vmatpush.msrb.mxu2 %v783_v36 }
 0xaa6   :  { %914 = vmatmul.msk.f32.vlgmr.msrb.gmra.mxu2 %vm100_vm4, %v789_v37 }
 0xaaa   :  { %v862_v54 = vpop.permute.xlu1 %861 }
 0xb18   :  { %v787_v62 = vpop.xlane.xlu2 %786 }
 0xb19   :  { %v788_v1 = vadd.f32 %v787_v62, %v745_v0 }
 0xb29   :  { %v811_v39 = vpop.f32.mrf.mxu2 }
 0xb2a   :  { %v815_v40 = vsub.f32 %v915_v38, %v811_v39 }
 0xb2c   :  { %v821_v43 = vmul.f32 %v819_v41, %v815_v40 }
 0xb2e   :  { %v825_v44 = vperm.slane %v821_v43, 0  ;;  %v827_v45 = vmul.f32 %v821_v43, %v821_v43 }
 0xb30   :  { %v828_v46 = vsel %vm46_vm0, %v827_v45, 0.0  ;;  %v826_v47 = vsel %vm822_vm9, %v825_v44, %v783_v36 }
 0xb31   :  { %829 = vadd.xlane.f32.xlu0 %v828_v46  ;;  %852 = vmatpush.msrb.mxu3 %v826_v47 }
 0xb32   :  { %916 = vmatmul.msk.f32.vlgmr.msrb.gmra.mxu3 %vm100_vm4, %v832_v48 }
 0xba4   :  { %v830_v2 = vpop.xlane.xlu0 %829 }
 0xba5   :  { %v831_v3 = vadd.f32 %v830_v2, %v788_v1 }
 0xbb5   :  { %v854_v52 = vpop.f32.mrf.mxu3 }
 0xbb6   :  { %v858_v53 = vsub.f32 %v917_v51, %v854_v52 }
 0xbb8   :  { %v864_v42 = vmul.f32 %v862_v54, %v858_v53 }
 0xbba   :  { %v865_v55 = vmul.f32 %v864_v42, %v864_v42 }
 0xbbc   :  { %v866_v56 = vsel %vm46_vm0, %v865_v55, 0.0  ;;  %vm1231_vm0 = vcmask 0  }
 0xbbd   :  { %867 = vadd.xlane.f32.xlu2 %v866_v56 }
 0xc30   :  { %v868_v4 = vpop.xlane.xlu2 %867 }
 0xc31   :  { %v869_v6 = vadd.f32 %v868_v4, %v831_v3 }
 0xc33   :  { %v873_v8 = vmul.f32 0.125, %v869_v6 }
 0xc35   :  { %v877_v10 = vmul.f32 0.5, %v873_v8 }
 0xc37   :  { %v878_v12 = vsub.f32 %v876_v9, %v877_v10 }
 0xc39   :  { %v880_v13 = vmul.f32 %v879_v11, %v878_v12 }
 0xc3b   :  { %v881_v22 = vsub.f32 %v1166_v17, %v880_v13 }
 0xc3d   :  { %882 = vst.msk [vmem:[#allocation9] sm:$0x1] %vm1231_vm0, %v881_v22 }
 0xc3e   :  { %893 = dma.vmem_to_hbm [thread:$0]  %s889_s19, 16, %s891_s22, [#allocation6]  }
 0xc3f   :  { %1023 = dma.done.wait [#allocation6], 16  }
 0xc40   :  { %1024 = vsyncadd [#allocation6], 4294967280 }
 0xc41   :  { %898 = vsyncpa [#allocation5], 1 }
 0xc42   :  { %899 = vsyncpa [#allocation6], 1 }
 0xc43   :  { %900 = vsyncpa [#allocation7], 1 }

</bundles_post_ra>
